<compile_context>
chip_gen: v5e
topology: v5e:2x2
jax: 0.10.0
libtpu: 0.0.40
codegen_flags: <defaults>
</compile_context>

<pallas_src>
import functools
import math

import numpy as np
import jax
import jax.numpy as jnp
from jax.experimental import pallas as pl
from jax.experimental.pallas import tpu as pltpu


VOCAB = 32
MAX_POS = 16
HIDDEN = 128          # BERT hidden == autoencoder input_dim
FFN = 256
AE_HIDDEN = 64
LATENT = 10           # autoencoder latent == num_qubits
OUT_DIM = 128         # final_proj output_dim

# Order in which weight arrays are passed to the fused kernel.
WEIGHT_KEYS = (
    "ln_emb_g", "ln_emb_b",
    "wqkv", "bqkv",
    "wo", "bo",
    "ln1_g", "ln1_b",
    "w1", "b1", "w2", "b2",
    "ln2_g", "ln2_b",
    "ae_w1", "ae_b1", "ae_w2", "ae_b2",
    "fp_w", "fp_b",
    "theta", "pair_w",
)


# ----------------------------------------------------------------------------
# Fused kernel: one grid step == one batch element.
# ----------------------------------------------------------------------------
def _hybrid_kernel(x_ref, bias_ref,
                   ln_emb_g, ln_emb_b,
                   wqkv, bqkv, wo, bo,
                   ln1_g, ln1_b,
                   w1, b1, w2, b2,
                   ln2_g, ln2_b,
                   ae_w1, ae_b1, ae_w2, ae_b2,
                   fp_w, fp_b,
                   theta, pair_w,
                   out_ref, energy_ref,
                   *, hidden, nq, scale, eps):
    def layernorm(v, g_ref, b_ref):
        mu = jnp.mean(v, axis=-1, keepdims=True)
        var = jnp.mean(jnp.square(v - mu), axis=-1, keepdims=True)
        return (v - mu) * jax.lax.rsqrt(var + eps) * g_ref[...] + b_ref[...]

    # ---- embedding layer-norm ----------------------------------------------
    x = layernorm(x_ref[0], ln_emb_g, ln_emb_b)                    # (S, H)

    # ---- self-attention (single head, fused QKV matmul) ---------------------
    qkv = jnp.dot(x, wqkv[...], preferred_element_type=jnp.float32) + bqkv[...]
    q = qkv[:, :hidden]
    k = qkv[:, hidden:2 * hidden]
    v = qkv[:, 2 * hidden:]

    s = jax.lax.dot_general(q, k, (((1,), (1,)), ((), ())),
                            preferred_element_type=jnp.float32) * scale
    s = s + bias_ref[0]                     # additive key mask, (S,S) + (1,S)
    s = s - jnp.max(s, axis=-1, keepdims=True)
    p = jnp.exp(s)
    p = p * pl.reciprocal(jnp.sum(p, axis=-1, keepdims=True), approx=True)
    ctx = jnp.dot(p, v, preferred_element_type=jnp.float32)
    attn = jnp.dot(ctx, wo[...], preferred_element_type=jnp.float32) + bo[...]
    x = layernorm(x + attn, ln1_g, ln1_b)   # residual add fused into LN

    # ---- feed-forward (fused w1 + gelu + w2) --------------------------------
    h = jnp.dot(x, w1[...], preferred_element_type=jnp.float32) + b1[...]
    h = jax.nn.gelu(h, approximate=True)    # TODO(synk): exact erf GELU
    h = jnp.dot(h, w2[...], preferred_element_type=jnp.float32) + b2[...]
    x = layernorm(x + h, ln2_g, ln2_b)

    # ---- mean pool over sequence (includes padding, as in reference) --------
    emb = jnp.mean(x, axis=0, keepdims=True)                       # (1, H)

    # ---- autoencoder encoder -------------------------------------------------
    z1 = jnp.dot(emb, ae_w1[...], preferred_element_type=jnp.float32) + ae_b1[...]
    z1 = jnp.maximum(z1, 0.0)
    z = jnp.dot(z1, ae_w2[...], preferred_element_type=jnp.float32) + ae_b2[...]  # (1, nq)

    # ---- final projection -----------------------------------------------------
    out_ref[0] = jnp.dot(z, fp_w[...], preferred_element_type=jnp.float32) + fp_b[...]

    # ---- exact VQE energy (vectorized closed form) ---------------------------
    c = jnp.cos(z * theta[...])                                    # (1, nq)
    # Inclusive cumulative product P_i = prod_{k<=i} c_k (tiny static unroll).
    idx = jax.lax.broadcasted_iota(jnp.int32, (1, nq), 1)
    cum = c
    run = c[:, 0:1]
    for i in range(1, nq):
        run = run * c[:, i:i + 1]
        cum = jnp.where(idx == i, run, cum)
    zp = z * cum                 # z_i * P_i
    zq = z / cum                 # z_i / P_i   (P_i != 0 for the small angles here)
    e_single = jnp.sum(zp, axis=-1, keepdims=True)                 # sum_i z_i <Z_i>
    e_pairs = jnp.sum(
        jnp.dot(zq, pair_w[...], preferred_element_type=jnp.float32) * zp,
        axis=-1, keepdims=True)                                    # sum_{i<j} W_ij z_i z_j <Z_i Z_j>
    energy_ref[0] = e_single + e_pairs


# ----------------------------------------------------------------------------
# Parameters (deterministic, synthetic stand-in for the pretrained modules)
# ----------------------------------------------------------------------------
def init_params(key):
    ks = jax.random.split(key, 12)

    def w(k, shape, scale=0.05):
        return (scale * jax.random.normal(k, shape)).astype(jnp.float32)

    wq = w(ks[2], (HIDDEN, HIDDEN))
    wk = w(ks[3], (HIDDEN, HIDDEN))
    wv = w(ks[4], (HIDDEN, HIDDEN))

    # VQE constructor inputs are NumPy arrays in the original module; build
    # them in writable NumPy (fixes the previous read-only fill_diagonal crash).
    rng = np.random.default_rng(0)
    corr_np = rng.uniform(-1.0, 1.0, size=(LATENT, LATENT)).astype(np.float32)
    corr_np = ((corr_np + corr_np.T) / 2.0).astype(np.float32)
    np.fill_diagonal(corr_np, 1.0)
    high_corr_mask = (np.abs(corr_np) > 0.5) & ~np.eye(LATENT, dtype=bool)
    # Static pair weights: corr[i,j] for masked i<j pairs, else 0.
    pair_w_np = np.where(np.triu(high_corr_mask, k=1), corr_np, 0.0).astype(np.float32)

    params = dict(
        tok_emb=w(ks[0], (VOCAB, HIDDEN)),
        pos_emb=w(ks[1], (MAX_POS, HIDDEN)),
        ln_emb_g=jnp.ones((1, HIDDEN), jnp.float32),
        ln_emb_b=jnp.zeros((1, HIDDEN), jnp.float32),
        wqkv=jnp.concatenate([wq, wk, wv], axis=1),          # fused (H, 3H)
        bqkv=jnp.zeros((1, 3 * HIDDEN), jnp.float32),
        wo=w(ks[5], (HIDDEN, HIDDEN)), bo=jnp.zeros((1, HIDDEN), jnp.float32),
        ln1_g=jnp.ones((1, HIDDEN), jnp.float32),
        ln1_b=jnp.zeros((1, HIDDEN), jnp.float32),
        w1=w(ks[6], (HIDDEN, FFN)), b1=jnp.zeros((1, FFN), jnp.float32),
        w2=w(ks[7], (FFN, HIDDEN)), b2=jnp.zeros((1, HIDDEN), jnp.float32),
        ln2_g=jnp.ones((1, HIDDEN), jnp.float32),
        ln2_b=jnp.zeros((1, HIDDEN), jnp.float32),
        # Autoencoder: Linear(128, 64) -> ReLU -> Linear(64, 10)
        ae_w1=w(ks[8], (HIDDEN, AE_HIDDEN)), ae_b1=jnp.zeros((1, AE_HIDDEN), jnp.float32),
        ae_w2=w(ks[9], (AE_HIDDEN, LATENT)), ae_b2=jnp.zeros((1, LATENT), jnp.float32),
        # final_proj: Linear(10, 128)
        fp_w=w(ks[10], (LATENT, OUT_DIM)), fp_b=jnp.zeros((1, OUT_DIM), jnp.float32),
        # QuantumCircuitWithParams.trainable_params ~ torch.rand(num_qubits)
        theta=jax.random.uniform(ks[11], (1, LATENT), dtype=jnp.float32),
        pair_w=jnp.asarray(pair_w_np),
    )
    return params


# ----------------------------------------------------------------------------
# HybridEncoder forward
# ----------------------------------------------------------------------------
def hybrid_encoder_forward(params, input_ids, attention_mask):
    bsz, seq = input_ids.shape

    # Embedding gather + position embeddings (host/XLA side; gather has no
    # clean rectangular BlockSpec equivalent at this vocab size).
    x = (jnp.take(params["tok_emb"], input_ids, axis=0)
         + params["pos_emb"][:seq][None]).astype(jnp.float32)

    # Precomputed additive attention-mask bias (hoisted out of the kernel).
    bias = ((1.0 - attention_mask.astype(jnp.float32)) * -1e9).reshape(bsz, 1, seq)

    weights = [params[k] for k in WEIGHT_KEYS]

    kernel = functools.partial(
        _hybrid_kernel, hidden=HIDDEN, nq=LATENT,
        scale=1.0 / math.sqrt(HIDDEN), eps=1e-12)

    in_specs = [
        pl.BlockSpec((1, seq, HIDDEN), lambda b: (b, 0, 0)),
        pl.BlockSpec((1, 1, seq), lambda b: (b, 0, 0)),
    ] + [
        pl.BlockSpec(wt.shape, lambda b, nd=wt.ndim: (0,) * nd) for wt in weights
    ]

    out, energy = pl.pallas_call(
        kernel,
        grid=(bsz,),
        in_specs=in_specs,
        out_specs=(
            pl.BlockSpec((1, 1, OUT_DIM), lambda b: (b, 0, 0)),
            pl.BlockSpec((1, 1, 1), lambda b: (b, 0, 0)),
        ),
        out_shape=(
            jax.ShapeDtypeStruct((bsz, 1, OUT_DIM), jnp.float32),
            jax.ShapeDtypeStruct((bsz, 1, 1), jnp.float32),
        ),
        compiler_params=pltpu.CompilerParams(
            dimension_semantics=("parallel",),      # shards batch across v7x TCs
            vmem_limit_bytes=32 * 1024 * 1024,      # safe on v5e/v6e/v7x
        ),
    )(x, bias, *weights)

    encoder_out = out.reshape(bsz, OUT_DIM)
    vqe_loss = jnp.mean(energy)                     # batch-mean energy (scalar)
    return encoder_out, vqe_loss


# ----------------------------------------------------------------------------
if __name__ == "__main__":
    params = init_params(jax.random.PRNGKey(0))

    B, S = 2, 8
    k_ids, _ = jax.random.split(jax.random.PRNGKey(0))
    input_ids = jax.random.randint(k_ids, (B, S), 0, VOCAB, dtype=jnp.int32)
    lengths = jnp.array([[S], [5]], dtype=jnp.int32)
    attention_mask = (jnp.arange(S)[None, :] < lengths).astype(jnp.float32)

    encoder_out, vqe_loss = hybrid_encoder_forward(params, input_ids, attention_mask)
    jax.block_until_ready(encoder_out)
    jax.block_until_ready(vqe_loss)

    assert encoder_out.shape == (B, OUT_DIM)
    assert vqe_loss.shape == ()
    print("KERNEL_OK")
</pallas_src>

<mosaic_0001>
module attributes {stable_mosaic.version = 11 : i64} {
  func.func @_hybrid_kernel(%arg0: i32, %arg1: memref<1x8x128xf32, #tpu.memory_space<vmem>>, %arg2: memref<1x1x8xf32, #tpu.memory_space<vmem>>, %arg3: memref<1x128xf32, #tpu.memory_space<vmem>>, %arg4: memref<1x128xf32, #tpu.memory_space<vmem>>, %arg5: memref<128x384xf32, #tpu.memory_space<vmem>>, %arg6: memref<1x384xf32, #tpu.memory_space<vmem>>, %arg7: memref<128x128xf32, #tpu.memory_space<vmem>>, %arg8: memref<1x128xf32, #tpu.memory_space<vmem>>, %arg9: memref<1x128xf32, #tpu.memory_space<vmem>>, %arg10: memref<1x128xf32, #tpu.memory_space<vmem>>, %arg11: memref<128x256xf32, #tpu.memory_space<vmem>>, %arg12: memref<1x256xf32, #tpu.memory_space<vmem>>, %arg13: memref<256x128xf32, #tpu.memory_space<vmem>>, %arg14: memref<1x128xf32, #tpu.memory_space<vmem>>, %arg15: memref<1x128xf32, #tpu.memory_space<vmem>>, %arg16: memref<1x128xf32, #tpu.memory_space<vmem>>, %arg17: memref<128x64xf32, #tpu.memory_space<vmem>>, %arg18: memref<1x64xf32, #tpu.memory_space<vmem>>, %arg19: memref<64x10xf32, #tpu.memory_space<vmem>>, %arg20: memref<1x10xf32, #tpu.memory_space<vmem>>, %arg21: memref<10x128xf32, #tpu.memory_space<vmem>>, %arg22: memref<1x128xf32, #tpu.memory_space<vmem>>, %arg23: memref<1x10xf32, #tpu.memory_space<vmem>>, %arg24: memref<10x10xf32, #tpu.memory_space<vmem>>, %arg25: memref<1x1x128xf32, #tpu.memory_space<vmem>>, %arg26: memref<1x1x1xf32, #tpu.memory_space<vmem>>) attributes {dimension_semantics = [#tpu.dimension_semantics<parallel>], iteration_bounds = array<i64: 2>, scalar_prefetch = 0 : i64, scratch_operands = 0 : i64, tpu.core_type = #tpu.core_type<tc>, window_params = [{transform_indices = @transform_0, window_bounds = array<i64: 1, 8, 128>}, {transform_indices = @transform_1, window_bounds = array<i64: 1, 1, 8>}, {pipeline_mode = #tpu.pipeline_mode<synchronous>, transform_indices = @transform_2, window_bounds = array<i64: 1, 128>}, {pipeline_mode = #tpu.pipeline_mode<synchronous>, transform_indices = @transform_3, window_bounds = array<i64: 1, 128>}, {pipeline_mode = #tpu.pipeline_mode<synchronous>, transform_indices = @transform_4, window_bounds = array<i64: 128, 384>}, {pipeline_mode = #tpu.pipeline_mode<synchronous>, transform_indices = @transform_5, window_bounds = array<i64: 1, 384>}, {pipeline_mode = #tpu.pipeline_mode<synchronous>, transform_indices = @transform_6, window_bounds = array<i64: 128, 128>}, {pipeline_mode = #tpu.pipeline_mode<synchronous>, transform_indices = @transform_7, window_bounds = array<i64: 1, 128>}, {pipeline_mode = #tpu.pipeline_mode<synchronous>, transform_indices = @transform_8, window_bounds = array<i64: 1, 128>}, {pipeline_mode = #tpu.pipeline_mode<synchronous>, transform_indices = @transform_9, window_bounds = array<i64: 1, 128>}, {pipeline_mode = #tpu.pipeline_mode<synchronous>, transform_indices = @transform_10, window_bounds = array<i64: 128, 256>}, {pipeline_mode = #tpu.pipeline_mode<synchronous>, transform_indices = @transform_11, window_bounds = array<i64: 1, 256>}, {pipeline_mode = #tpu.pipeline_mode<synchronous>, transform_indices = @transform_12, window_bounds = array<i64: 256, 128>}, {pipeline_mode = #tpu.pipeline_mode<synchronous>, transform_indices = @transform_13, window_bounds = array<i64: 1, 128>}, {pipeline_mode = #tpu.pipeline_mode<synchronous>, transform_indices = @transform_14, window_bounds = array<i64: 1, 128>}, {pipeline_mode = #tpu.pipeline_mode<synchronous>, transform_indices = @transform_15, window_bounds = array<i64: 1, 128>}, {pipeline_mode = #tpu.pipeline_mode<synchronous>, transform_indices = @transform_16, window_bounds = array<i64: 128, 64>}, {pipeline_mode = #tpu.pipeline_mode<synchronous>, transform_indices = @transform_17, window_bounds = array<i64: 1, 64>}, {pipeline_mode = #tpu.pipeline_mode<synchronous>, transform_indices = @transform_18, window_bounds = array<i64: 64, 10>}, {pipeline_mode = #tpu.pipeline_mode<synchronous>, transform_indices = @transform_19, window_bounds = array<i64: 1, 10>}, {pipeline_mode = #tpu.pipeline_mode<synchronous>, transform_indices = @transform_20, window_bounds = array<i64: 10, 128>}, {pipeline_mode = #tpu.pipeline_mode<synchronous>, transform_indices = @transform_21, window_bounds = array<i64: 1, 128>}, {pipeline_mode = #tpu.pipeline_mode<synchronous>, transform_indices = @transform_22, window_bounds = array<i64: 1, 10>}, {pipeline_mode = #tpu.pipeline_mode<synchronous>, transform_indices = @transform_23, window_bounds = array<i64: 10, 10>}, {transform_indices = @transform_24, window_bounds = array<i64: 1, 1, 128>}, {transform_indices = @transform_25, window_bounds = array<i64: 1, 1, 1>}]} {
    %c0 = arith.constant 0 : index
    %c0_0 = arith.constant 0 : index
    %c0_1 = arith.constant 0 : index
    %0 = vector.load %arg1[%c0, %c0_0, %c0_1] : memref<1x8x128xf32, #tpu.memory_space<vmem>>, vector<1x8x128xf32>
    %1 = vector.shape_cast %0 : vector<1x8x128xf32> to vector<8x128xf32>
    %cst = arith.constant dense<0.000000e+00> : vector<8xf32>
    %2 = vector.multi_reduction <add>, %1, %cst [1] : vector<8x128xf32> to vector<8xf32>
    %3 = vector.shape_cast %2 : vector<8xf32> to vector<8x1xf32>
    %cst_2 = arith.constant 1.280000e+02 : f32
    %4 = vector.broadcast %cst_2 : f32 to vector<8x1xf32>
    %5 = arith.divf %3, %4 : vector<8x1xf32>
    %6 = vector.broadcast %5 : vector<8x1xf32> to vector<8x128xf32>
    %7 = arith.subf %1, %6 : vector<8x128xf32>
    %8 = arith.mulf %7, %7 : vector<8x128xf32>
    %cst_3 = arith.constant dense<0.000000e+00> : vector<8xf32>
    %9 = vector.multi_reduction <add>, %8, %cst_3 [1] : vector<8x128xf32> to vector<8xf32>
    %10 = vector.shape_cast %9 : vector<8xf32> to vector<8x1xf32>
    %cst_4 = arith.constant 1.280000e+02 : f32
    %11 = vector.broadcast %cst_4 : f32 to vector<8x1xf32>
    %12 = arith.divf %10, %11 : vector<8x1xf32>
    %13 = vector.broadcast %5 : vector<8x1xf32> to vector<8x128xf32>
    %14 = arith.subf %1, %13 : vector<8x128xf32>
    %cst_5 = arith.constant 9.99999996E-13 : f32
    %15 = vector.broadcast %cst_5 : f32 to vector<8x1xf32>
    %16 = arith.addf %12, %15 : vector<8x1xf32>
    %17 = math.rsqrt %16 : vector<8x1xf32>
    %18 = vector.broadcast %17 : vector<8x1xf32> to vector<8x128xf32>
    %19 = arith.mulf %14, %18 : vector<8x128xf32>
    %c0_6 = arith.constant 0 : index
    %c0_7 = arith.constant 0 : index
    %20 = vector.load %arg3[%c0_6, %c0_7] : memref<1x128xf32, #tpu.memory_space<vmem>>, vector<1x128xf32>
    %21 = vector.broadcast %20 : vector<1x128xf32> to vector<8x128xf32>
    %22 = arith.mulf %19, %21 : vector<8x128xf32>
    %c0_8 = arith.constant 0 : index
    %c0_9 = arith.constant 0 : index
    %23 = vector.load %arg4[%c0_8, %c0_9] : memref<1x128xf32, #tpu.memory_space<vmem>>, vector<1x128xf32>
    %24 = vector.broadcast %23 : vector<1x128xf32> to vector<8x128xf32>
    %25 = arith.addf %22, %24 : vector<8x128xf32>
    %c0_10 = arith.constant 0 : index
    %c0_11 = arith.constant 0 : index
    %26 = vector.load %arg5[%c0_10, %c0_11] : memref<128x384xf32, #tpu.memory_space<vmem>>, vector<128x384xf32>
    %cst_12 = arith.constant dense<0.000000e+00> : vector<8x384xf32>
    %27 = tpu.matmul %25, %26, %cst_12 {dimension_numbers = #tpu.dot_dimension_numbers<[1], [0], [0], [1], [0, 0, 1, 1], [], []>} : vector<8x128xf32>, vector<128x384xf32>, vector<8x384xf32> -> vector<8x384xf32>
    %c0_13 = arith.constant 0 : index
    %c0_14 = arith.constant 0 : index
    %28 = vector.load %arg6[%c0_13, %c0_14] : memref<1x384xf32, #tpu.memory_space<vmem>>, vector<1x384xf32>
    %29 = vector.broadcast %28 : vector<1x384xf32> to vector<8x384xf32>
    %30 = arith.addf %27, %29 : vector<8x384xf32>
    %31 = vector.extract_strided_slice %30 {offsets = [0, 0], sizes = [8, 128], strides = [1, 1]} : vector<8x384xf32> to vector<8x128xf32>
    %32 = vector.extract_strided_slice %30 {offsets = [0, 128], sizes = [8, 128], strides = [1, 1]} : vector<8x384xf32> to vector<8x128xf32>
    %33 = vector.extract_strided_slice %30 {offsets = [0, 256], sizes = [8, 128], strides = [1, 1]} : vector<8x384xf32> to vector<8x128xf32>
    %cst_15 = arith.constant dense<0.000000e+00> : vector<8x8xf32>
    %34 = tpu.matmul %31, %32, %cst_15 {dimension_numbers = #tpu.dot_dimension_numbers<[1], [1], [0], [0], [0, 0, 1, 0], [], []>} : vector<8x128xf32>, vector<8x128xf32>, vector<8x8xf32> -> vector<8x8xf32>
    %cst_16 = arith.constant 0.0883883461 : f32
    %35 = vector.broadcast %cst_16 : f32 to vector<8x8xf32>
    %36 = arith.mulf %34, %35 : vector<8x8xf32>
    %c0_17 = arith.constant 0 : index
    %c0_18 = arith.constant 0 : index
    %c0_19 = arith.constant 0 : index
    %37 = vector.load %arg2[%c0_17, %c0_18, %c0_19] : memref<1x1x8xf32, #tpu.memory_space<vmem>>, vector<1x1x8xf32>
    %38 = vector.shape_cast %37 : vector<1x1x8xf32> to vector<1x8xf32>
    %39 = vector.broadcast %38 : vector<1x8xf32> to vector<8x8xf32>
    %40 = arith.addf %36, %39 : vector<8x8xf32>
    %cst_20 = arith.constant dense<0xFF800000> : vector<8xf32>
    %41 = vector.multi_reduction <maximumf>, %40, %cst_20 [1] : vector<8x8xf32> to vector<8xf32>
    %42 = vector.shape_cast %41 : vector<8xf32> to vector<8x1xf32>
    %43 = vector.broadcast %42 : vector<8x1xf32> to vector<8x8xf32>
    %44 = arith.subf %40, %43 : vector<8x8xf32>
    %45 = math.exp %44 : vector<8x8xf32>
    %cst_21 = arith.constant dense<0.000000e+00> : vector<8xf32>
    %46 = vector.multi_reduction <add>, %45, %cst_21 [1] : vector<8x8xf32> to vector<8xf32>
    %47 = vector.shape_cast %46 : vector<8xf32> to vector<8x1xf32>
    %48 = tpu.reciprocal %47 {approx = true} : vector<8x1xf32> -> vector<8x1xf32>
    %49 = vector.broadcast %48 : vector<8x1xf32> to vector<8x8xf32>
    %50 = arith.mulf %45, %49 : vector<8x8xf32>
    %cst_22 = arith.constant dense<0.000000e+00> : vector<8x128xf32>
    %51 = tpu.matmul %50, %33, %cst_22 {dimension_numbers = #tpu.dot_dimension_numbers<[1], [0], [0], [1], [0, 0, 1, 1], [], []>} : vector<8x8xf32>, vector<8x128xf32>, vector<8x128xf32> -> vector<8x128xf32>
    %c0_23 = arith.constant 0 : index
    %c0_24 = arith.constant 0 : index
    %52 = vector.load %arg7[%c0_23, %c0_24] : memref<128x128xf32, #tpu.memory_space<vmem>>, vector<128x128xf32>
    %cst_25 = arith.constant dense<0.000000e+00> : vector<8x128xf32>
    %53 = tpu.matmul %51, %52, %cst_25 {dimension_numbers = #tpu.dot_dimension_numbers<[1], [0], [0], [1], [0, 0, 1, 1], [], []>} : vector<8x128xf32>, vector<128x128xf32>, vector<8x128xf32> -> vector<8x128xf32>
    %c0_26 = arith.constant 0 : index
    %c0_27 = arith.constant 0 : index
    %54 = vector.load %arg8[%c0_26, %c0_27] : memref<1x128xf32, #tpu.memory_space<vmem>>, vector<1x128xf32>
    %55 = vector.broadcast %54 : vector<1x128xf32> to vector<8x128xf32>
    %56 = arith.addf %53, %55 : vector<8x128xf32>
    %57 = arith.addf %25, %56 : vector<8x128xf32>
    %cst_28 = arith.constant dense<0.000000e+00> : vector<8xf32>
    %58 = vector.multi_reduction <add>, %57, %cst_28 [1] : vector<8x128xf32> to vector<8xf32>
    %59 = vector.shape_cast %58 : vector<8xf32> to vector<8x1xf32>
    %cst_29 = arith.constant 1.280000e+02 : f32
    %60 = vector.broadcast %cst_29 : f32 to vector<8x1xf32>
    %61 = arith.divf %59, %60 : vector<8x1xf32>
    %62 = vector.broadcast %61 : vector<8x1xf32> to vector<8x128xf32>
    %63 = arith.subf %57, %62 : vector<8x128xf32>
    %64 = arith.mulf %63, %63 : vector<8x128xf32>
    %cst_30 = arith.constant dense<0.000000e+00> : vector<8xf32>
    %65 = vector.multi_reduction <add>, %64, %cst_30 [1] : vector<8x128xf32> to vector<8xf32>
    %66 = vector.shape_cast %65 : vector<8xf32> to vector<8x1xf32>
    %cst_31 = arith.constant 1.280000e+02 : f32
    %67 = vector.broadcast %cst_31 : f32 to vector<8x1xf32>
    %68 = arith.divf %66, %67 : vector<8x1xf32>
    %69 = vector.broadcast %61 : vector<8x1xf32> to vector<8x128xf32>
    %70 = arith.subf %57, %69 : vector<8x128xf32>
    %cst_32 = arith.constant 9.99999996E-13 : f32
    %71 = vector.broadcast %cst_32 : f32 to vector<8x1xf32>
    %72 = arith.addf %68, %71 : vector<8x1xf32>
    %73 = math.rsqrt %72 : vector<8x1xf32>
    %74 = vector.broadcast %73 : vector<8x1xf32> to vector<8x128xf32>
    %75 = arith.mulf %70, %74 : vector<8x128xf32>
    %c0_33 = arith.constant 0 : index
    %c0_34 = arith.constant 0 : index
    %76 = vector.load %arg9[%c0_33, %c0_34] : memref<1x128xf32, #tpu.memory_space<vmem>>, vector<1x128xf32>
    %77 = vector.broadcast %76 : vector<1x128xf32> to vector<8x128xf32>
    %78 = arith.mulf %75, %77 : vector<8x128xf32>
    %c0_35 = arith.constant 0 : index
    %c0_36 = arith.constant 0 : index
    %79 = vector.load %arg10[%c0_35, %c0_36] : memref<1x128xf32, #tpu.memory_space<vmem>>, vector<1x128xf32>
    %80 = vector.broadcast %79 : vector<1x128xf32> to vector<8x128xf32>
    %81 = arith.addf %78, %80 : vector<8x128xf32>
    %c0_37 = arith.constant 0 : index
    %c0_38 = arith.constant 0 : index
    %82 = vector.load %arg11[%c0_37, %c0_38] : memref<128x256xf32, #tpu.memory_space<vmem>>, vector<128x256xf32>
    %cst_39 = arith.constant dense<0.000000e+00> : vector<8x256xf32>
    %83 = tpu.matmul %81, %82, %cst_39 {dimension_numbers = #tpu.dot_dimension_numbers<[1], [0], [0], [1], [0, 0, 1, 1], [], []>} : vector<8x128xf32>, vector<128x256xf32>, vector<8x256xf32> -> vector<8x256xf32>
    %c0_40 = arith.constant 0 : index
    %c0_41 = arith.constant 0 : index
    %84 = vector.load %arg12[%c0_40, %c0_41] : memref<1x256xf32, #tpu.memory_space<vmem>>, vector<1x256xf32>
    %85 = vector.broadcast %84 : vector<1x256xf32> to vector<8x256xf32>
    %86 = arith.addf %83, %85 : vector<8x256xf32>
    %87 = arith.mulf %86, %86 : vector<8x256xf32>
    %88 = arith.mulf %86, %87 : vector<8x256xf32>
    %cst_42 = arith.constant 4.471500e-02 : f32
    %89 = vector.broadcast %cst_42 : f32 to vector<8x256xf32>
    %90 = arith.mulf %89, %88 : vector<8x256xf32>
    %91 = arith.addf %86, %90 : vector<8x256xf32>
    %cst_43 = arith.constant 0.797884583 : f32
    %92 = vector.broadcast %cst_43 : f32 to vector<8x256xf32>
    %93 = arith.mulf %92, %91 : vector<8x256xf32>
    %94 = math.tanh %93 : vector<8x256xf32>
    %cst_44 = arith.constant 1.000000e+00 : f32
    %95 = vector.broadcast %cst_44 : f32 to vector<8x256xf32>
    %96 = arith.addf %95, %94 : vector<8x256xf32>
    %cst_45 = arith.constant 5.000000e-01 : f32
    %97 = vector.broadcast %cst_45 : f32 to vector<8x256xf32>
    %98 = arith.mulf %97, %96 : vector<8x256xf32>
    %99 = arith.mulf %86, %98 : vector<8x256xf32>
    %c0_46 = arith.constant 0 : index
    %c0_47 = arith.constant 0 : index
    %100 = vector.load %arg13[%c0_46, %c0_47] : memref<256x128xf32, #tpu.memory_space<vmem>>, vector<256x128xf32>
    %cst_48 = arith.constant dense<0.000000e+00> : vector<8x128xf32>
    %101 = tpu.matmul %99, %100, %cst_48 {dimension_numbers = #tpu.dot_dimension_numbers<[1], [0], [0], [1], [0, 0, 1, 1], [], []>} : vector<8x256xf32>, vector<256x128xf32>, vector<8x128xf32> -> vector<8x128xf32>
    %c0_49 = arith.constant 0 : index
    %c0_50 = arith.constant 0 : index
    %102 = vector.load %arg14[%c0_49, %c0_50] : memref<1x128xf32, #tpu.memory_space<vmem>>, vector<1x128xf32>
    %103 = vector.broadcast %102 : vector<1x128xf32> to vector<8x128xf32>
    %104 = arith.addf %101, %103 : vector<8x128xf32>
    %105 = arith.addf %81, %104 : vector<8x128xf32>
    %cst_51 = arith.constant dense<0.000000e+00> : vector<8xf32>
    %106 = vector.multi_reduction <add>, %105, %cst_51 [1] : vector<8x128xf32> to vector<8xf32>
    %107 = vector.shape_cast %106 : vector<8xf32> to vector<8x1xf32>
    %cst_52 = arith.constant 1.280000e+02 : f32
    %108 = vector.broadcast %cst_52 : f32 to vector<8x1xf32>
    %109 = arith.divf %107, %108 : vector<8x1xf32>
    %110 = vector.broadcast %109 : vector<8x1xf32> to vector<8x128xf32>
    %111 = arith.subf %105, %110 : vector<8x128xf32>
    %112 = arith.mulf %111, %111 : vector<8x128xf32>
    %cst_53 = arith.constant dense<0.000000e+00> : vector<8xf32>
    %113 = vector.multi_reduction <add>, %112, %cst_53 [1] : vector<8x128xf32> to vector<8xf32>
    %114 = vector.shape_cast %113 : vector<8xf32> to vector<8x1xf32>
    %cst_54 = arith.constant 1.280000e+02 : f32
    %115 = vector.broadcast %cst_54 : f32 to vector<8x1xf32>
    %116 = arith.divf %114, %115 : vector<8x1xf32>
    %117 = vector.broadcast %109 : vector<8x1xf32> to vector<8x128xf32>
    %118 = arith.subf %105, %117 : vector<8x128xf32>
    %cst_55 = arith.constant 9.99999996E-13 : f32
    %119 = vector.broadcast %cst_55 : f32 to vector<8x1xf32>
    %120 = arith.addf %116, %119 : vector<8x1xf32>
    %121 = math.rsqrt %120 : vector<8x1xf32>
    %122 = vector.broadcast %121 : vector<8x1xf32> to vector<8x128xf32>
    %123 = arith.mulf %118, %122 : vector<8x128xf32>
    %c0_56 = arith.constant 0 : index
    %c0_57 = arith.constant 0 : index
    %124 = vector.load %arg15[%c0_56, %c0_57] : memref<1x128xf32, #tpu.memory_space<vmem>>, vector<1x128xf32>
    %125 = vector.broadcast %124 : vector<1x128xf32> to vector<8x128xf32>
    %126 = arith.mulf %123, %125 : vector<8x128xf32>
    %c0_58 = arith.constant 0 : index
    %c0_59 = arith.constant 0 : index
    %127 = vector.load %arg16[%c0_58, %c0_59] : memref<1x128xf32, #tpu.memory_space<vmem>>, vector<1x128xf32>
    %128 = vector.broadcast %127 : vector<1x128xf32> to vector<8x128xf32>
    %129 = arith.addf %126, %128 : vector<8x128xf32>
    %cst_60 = arith.constant dense<0.000000e+00> : vector<128xf32>
    %130 = vector.multi_reduction <add>, %129, %cst_60 [0] : vector<8x128xf32> to vector<128xf32>
    %131 = vector.shape_cast %130 : vector<128xf32> to vector<1x128xf32>
    %cst_61 = arith.constant 8.000000e+00 : f32
    %132 = vector.broadcast %cst_61 : f32 to vector<1x128xf32>
    %133 = arith.divf %131, %132 : vector<1x128xf32>
    %c0_62 = arith.constant 0 : index
    %c0_63 = arith.constant 0 : index
    %134 = vector.load %arg17[%c0_62, %c0_63] : memref<128x64xf32, #tpu.memory_space<vmem>>, vector<128x64xf32>
    %cst_64 = arith.constant dense<0.000000e+00> : vector<1x64xf32>
    %135 = tpu.matmul %133, %134, %cst_64 {dimension_numbers = #tpu.dot_dimension_numbers<[1], [0], [0], [1], [0, 0, 1, 1], [], []>} : vector<1x128xf32>, vector<128x64xf32>, vector<1x64xf32> -> vector<1x64xf32>
    %c0_65 = arith.constant 0 : index
    %c0_66 = arith.constant 0 : index
    %136 = vector.load %arg18[%c0_65, %c0_66] : memref<1x64xf32, #tpu.memory_space<vmem>>, vector<1x64xf32>
    %137 = arith.addf %135, %136 : vector<1x64xf32>
    %cst_67 = arith.constant 0.000000e+00 : f32
    %138 = vector.broadcast %cst_67 : f32 to vector<1x64xf32>
    %139 = arith.maximumf %137, %138 : vector<1x64xf32>
    %c0_68 = arith.constant 0 : index
    %c0_69 = arith.constant 0 : index
    %140 = vector.load %arg19[%c0_68, %c0_69] : memref<64x10xf32, #tpu.memory_space<vmem>>, vector<64x10xf32>
    %cst_70 = arith.constant dense<0.000000e+00> : vector<1x10xf32>
    %141 = tpu.matmul %139, %140, %cst_70 {dimension_numbers = #tpu.dot_dimension_numbers<[1], [0], [0], [1], [0, 0, 1, 1], [], []>} : vector<1x64xf32>, vector<64x10xf32>, vector<1x10xf32> -> vector<1x10xf32>
    %c0_71 = arith.constant 0 : index
    %c0_72 = arith.constant 0 : index
    %142 = vector.load %arg20[%c0_71, %c0_72] : memref<1x10xf32, #tpu.memory_space<vmem>>, vector<1x10xf32>
    %143 = arith.addf %141, %142 : vector<1x10xf32>
    %c0_73 = arith.constant 0 : index
    %c0_74 = arith.constant 0 : index
    %144 = vector.load %arg21[%c0_73, %c0_74] : memref<10x128xf32, #tpu.memory_space<vmem>>, vector<10x128xf32>
    %cst_75 = arith.constant dense<0.000000e+00> : vector<1x128xf32>
    %145 = tpu.matmul %143, %144, %cst_75 {dimension_numbers = #tpu.dot_dimension_numbers<[1], [0], [0], [1], [0, 0, 1, 1], [], []>} : vector<1x10xf32>, vector<10x128xf32>, vector<1x128xf32> -> vector<1x128xf32>
    %c0_76 = arith.constant 0 : index
    %c0_77 = arith.constant 0 : index
    %146 = vector.load %arg22[%c0_76, %c0_77] : memref<1x128xf32, #tpu.memory_space<vmem>>, vector<1x128xf32>
    %147 = arith.addf %145, %146 : vector<1x128xf32>
    %c0_78 = arith.constant 0 : index
    %c0_79 = arith.constant 0 : index
    %c0_80 = arith.constant 0 : index
    %148 = vector.load %arg25[%c0_78, %c0_79, %c0_80] : memref<1x1x128xf32, #tpu.memory_space<vmem>>, vector<1x1x128xf32>
    %149 = vector.shape_cast %148 : vector<1x1x128xf32> to vector<1x128xf32>
    %150 = vector.shape_cast %147 : vector<1x128xf32> to vector<1x1x128xf32>
    tpu.vector_store %arg25[%c0_78, %c0_79, %c0_80], %150 {strides = array<i32>} : memref<1x1x128xf32, #tpu.memory_space<vmem>>, vector<1x1x128xf32>,
    %c0_81 = arith.constant 0 : index
    %c0_82 = arith.constant 0 : index
    %151 = vector.load %arg23[%c0_81, %c0_82] : memref<1x10xf32, #tpu.memory_space<vmem>>, vector<1x10xf32>
    %152 = arith.mulf %143, %151 : vector<1x10xf32>
    %153 = math.cos %152 : vector<1x10xf32>
    %154 = tpu.iota {dimensions = array<i32: 1>} : vector<1x10xi32>
    %155 = vector.extract_strided_slice %153 {offsets = [0, 0], sizes = [1, 1], strides = [1, 1]} : vector<1x10xf32> to vector<1x1xf32>
    %156 = vector.extract_strided_slice %153 {offsets = [0, 1], sizes = [1, 1], strides = [1, 1]} : vector<1x10xf32> to vector<1x1xf32>
    %157 = arith.mulf %155, %156 : vector<1x1xf32>
    %c1_i32 = arith.constant 1 : i32
    %158 = vector.broadcast %c1_i32 : i32 to vector<1x10xi32>
    %159 = arith.cmpi eq, %154, %158 : vector<1x10xi32>
    %160 = vector.shape_cast %157 : vector<1x1xf32> to vector<1x1xf32>
    %161 = vector.broadcast %160 : vector<1x1xf32> to vector<1x10xf32>
    %162 = arith.select %159, %161, %153 : vector<1x10xi1>, vector<1x10xf32>
    %163 = vector.extract_strided_slice %153 {offsets = [0, 2], sizes = [1, 1], strides = [1, 1]} : vector<1x10xf32> to vector<1x1xf32>
    %164 = arith.mulf %157, %163 : vector<1x1xf32>
    %c2_i32 = arith.constant 2 : i32
    %165 = vector.broadcast %c2_i32 : i32 to vector<1x10xi32>
    %166 = arith.cmpi eq, %154, %165 : vector<1x10xi32>
    %167 = vector.shape_cast %164 : vector<1x1xf32> to vector<1x1xf32>
    %168 = vector.broadcast %167 : vector<1x1xf32> to vector<1x10xf32>
    %169 = arith.select %166, %168, %162 : vector<1x10xi1>, vector<1x10xf32>
    %170 = vector.extract_strided_slice %153 {offsets = [0, 3], sizes = [1, 1], strides = [1, 1]} : vector<1x10xf32> to vector<1x1xf32>
    %171 = arith.mulf %164, %170 : vector<1x1xf32>
    %c3_i32 = arith.constant 3 : i32
    %172 = vector.broadcast %c3_i32 : i32 to vector<1x10xi32>
    %173 = arith.cmpi eq, %154, %172 : vector<1x10xi32>
    %174 = vector.shape_cast %171 : vector<1x1xf32> to vector<1x1xf32>
    %175 = vector.broadcast %174 : vector<1x1xf32> to vector<1x10xf32>
    %176 = arith.select %173, %175, %169 : vector<1x10xi1>, vector<1x10xf32>
    %177 = vector.extract_strided_slice %153 {offsets = [0, 4], sizes = [1, 1], strides = [1, 1]} : vector<1x10xf32> to vector<1x1xf32>
    %178 = arith.mulf %171, %177 : vector<1x1xf32>
    %c4_i32 = arith.constant 4 : i32
    %179 = vector.broadcast %c4_i32 : i32 to vector<1x10xi32>
    %180 = arith.cmpi eq, %154, %179 : vector<1x10xi32>
    %181 = vector.shape_cast %178 : vector<1x1xf32> to vector<1x1xf32>
    %182 = vector.broadcast %181 : vector<1x1xf32> to vector<1x10xf32>
    %183 = arith.select %180, %182, %176 : vector<1x10xi1>, vector<1x10xf32>
    %184 = vector.extract_strided_slice %153 {offsets = [0, 5], sizes = [1, 1], strides = [1, 1]} : vector<1x10xf32> to vector<1x1xf32>
    %185 = arith.mulf %178, %184 : vector<1x1xf32>
    %c5_i32 = arith.constant 5 : i32
    %186 = vector.broadcast %c5_i32 : i32 to vector<1x10xi32>
    %187 = arith.cmpi eq, %154, %186 : vector<1x10xi32>
    %188 = vector.shape_cast %185 : vector<1x1xf32> to vector<1x1xf32>
    %189 = vector.broadcast %188 : vector<1x1xf32> to vector<1x10xf32>
    %190 = arith.select %187, %189, %183 : vector<1x10xi1>, vector<1x10xf32>
    %191 = vector.extract_strided_slice %153 {offsets = [0, 6], sizes = [1, 1], strides = [1, 1]} : vector<1x10xf32> to vector<1x1xf32>
    %192 = arith.mulf %185, %191 : vector<1x1xf32>
    %c6_i32 = arith.constant 6 : i32
    %193 = vector.broadcast %c6_i32 : i32 to vector<1x10xi32>
    %194 = arith.cmpi eq, %154, %193 : vector<1x10xi32>
    %195 = vector.shape_cast %192 : vector<1x1xf32> to vector<1x1xf32>
    %196 = vector.broadcast %195 : vector<1x1xf32> to vector<1x10xf32>
    %197 = arith.select %194, %196, %190 : vector<1x10xi1>, vector<1x10xf32>
    %198 = vector.extract_strided_slice %153 {offsets = [0, 7], sizes = [1, 1], strides = [1, 1]} : vector<1x10xf32> to vector<1x1xf32>
    %199 = arith.mulf %192, %198 : vector<1x1xf32>
    %c7_i32 = arith.constant 7 : i32
    %200 = vector.broadcast %c7_i32 : i32 to vector<1x10xi32>
    %201 = arith.cmpi eq, %154, %200 : vector<1x10xi32>
    %202 = vector.shape_cast %199 : vector<1x1xf32> to vector<1x1xf32>
    %203 = vector.broadcast %202 : vector<1x1xf32> to vector<1x10xf32>
    %204 = arith.select %201, %203, %197 : vector<1x10xi1>, vector<1x10xf32>
    %205 = vector.extract_strided_slice %153 {offsets = [0, 8], sizes = [1, 1], strides = [1, 1]} : vector<1x10xf32> to vector<1x1xf32>
    %206 = arith.mulf %199, %205 : vector<1x1xf32>
    %c8_i32 = arith.constant 8 : i32
    %207 = vector.broadcast %c8_i32 : i32 to vector<1x10xi32>
    %208 = arith.cmpi eq, %154, %207 : vector<1x10xi32>
    %209 = vector.shape_cast %206 : vector<1x1xf32> to vector<1x1xf32>
    %210 = vector.broadcast %209 : vector<1x1xf32> to vector<1x10xf32>
    %211 = arith.select %208, %210, %204 : vector<1x10xi1>, vector<1x10xf32>
    %212 = vector.extract_strided_slice %153 {offsets = [0, 9], sizes = [1, 1], strides = [1, 1]} : vector<1x10xf32> to vector<1x1xf32>
    %213 = arith.mulf %206, %212 : vector<1x1xf32>
    %c9_i32 = arith.constant 9 : i32
    %214 = vector.broadcast %c9_i32 : i32 to vector<1x10xi32>
    %215 = arith.cmpi eq, %154, %214 : vector<1x10xi32>
    %216 = vector.shape_cast %213 : vector<1x1xf32> to vector<1x1xf32>
    %217 = vector.broadcast %216 : vector<1x1xf32> to vector<1x10xf32>
    %218 = arith.select %215, %217, %211 : vector<1x10xi1>, vector<1x10xf32>
    %219 = arith.mulf %143, %218 : vector<1x10xf32>
    %220 = arith.divf %143, %218 : vector<1x10xf32>
    %cst_83 = arith.constant dense<0.000000e+00> : vector<1xf32>
    %221 = vector.multi_reduction <add>, %219, %cst_83 [1] : vector<1x10xf32> to vector<1xf32>
    %222 = vector.shape_cast %221 : vector<1xf32> to vector<1x1xf32>
    %c0_84 = arith.constant 0 : index
    %c0_85 = arith.constant 0 : index
    %223 = vector.load %arg24[%c0_84, %c0_85] : memref<10x10xf32, #tpu.memory_space<vmem>>, vector<10x10xf32>
    %cst_86 = arith.constant dense<0.000000e+00> : vector<1x10xf32>
    %224 = tpu.matmul %220, %223, %cst_86 {dimension_numbers = #tpu.dot_dimension_numbers<[1], [0], [0], [1], [0, 0, 1, 1], [], []>} : vector<1x10xf32>, vector<10x10xf32>, vector<1x10xf32> -> vector<1x10xf32>
    %225 = arith.mulf %224, %219 : vector<1x10xf32>
    %cst_87 = arith.constant dense<0.000000e+00> : vector<1xf32>
    %226 = vector.multi_reduction <add>, %225, %cst_87 [1] : vector<1x10xf32> to vector<1xf32>
    %227 = vector.shape_cast %226 : vector<1xf32> to vector<1x1xf32>
    %228 = arith.addf %222, %227 : vector<1x1xf32>
    %c0_88 = arith.constant 0 : index
    %c0_89 = arith.constant 0 : index
    %c0_90 = arith.constant 0 : index
    %229 = vector.load %arg26[%c0_88, %c0_89, %c0_90] : memref<1x1x1xf32, #tpu.memory_space<vmem>>, vector<1x1x1xf32>
    %230 = vector.shape_cast %229 : vector<1x1x1xf32> to vector<1x1xf32>
    %231 = vector.shape_cast %228 : vector<1x1xf32> to vector<1x1x1xf32>
    tpu.vector_store %arg26[%c0_88, %c0_89, %c0_90], %231 {strides = array<i32>} : memref<1x1x1xf32, #tpu.memory_space<vmem>>, vector<1x1x1xf32>,
    return
  }
  func.func @transform_0(%arg0: i32) -> (i32, i32, i32) {
    %c0_i32 = arith.constant 0 : i32
    %c0_i32_0 = arith.constant 0 : i32
    %c0_i32_1 = arith.constant 0 : i32
    return %arg0, %c0_i32, %c0_i32_0 : i32, i32, i32
  }
  func.func @transform_1(%arg0: i32) -> (i32, i32, i32) {
    %c0_i32 = arith.constant 0 : i32
    %c0_i32_0 = arith.constant 0 : i32
    %c0_i32_1 = arith.constant 0 : i32
    return %arg0, %c0_i32, %c0_i32_0 : i32, i32, i32
  }
  func.func @transform_2(%arg0: i32) -> (i32, i32) {
    %c0_i32 = arith.constant 0 : i32
    %c0_i32_0 = arith.constant 0 : i32
    %c0_i32_1 = arith.constant 0 : i32
    return %c0_i32, %c0_i32_0 : i32, i32
  }
  func.func @transform_3(%arg0: i32) -> (i32, i32) {
    %c0_i32 = arith.constant 0 : i32
    %c0_i32_0 = arith.constant 0 : i32
    %c0_i32_1 = arith.constant 0 : i32
    return %c0_i32, %c0_i32_0 : i32, i32
  }
  func.func @transform_4(%arg0: i32) -> (i32, i32) {
    %c0_i32 = arith.constant 0 : i32
    %c0_i32_0 = arith.constant 0 : i32
    %c0_i32_1 = arith.constant 0 : i32
    return %c0_i32, %c0_i32_0 : i32, i32
  }
  func.func @transform_5(%arg0: i32) -> (i32, i32) {
    %c0_i32 = arith.constant 0 : i32
    %c0_i32_0 = arith.constant 0 : i32
    %c0_i32_1 = arith.constant 0 : i32
    return %c0_i32, %c0_i32_0 : i32, i32
  }
  func.func @transform_6(%arg0: i32) -> (i32, i32) {
    %c0_i32 = arith.constant 0 : i32
    %c0_i32_0 = arith.constant 0 : i32
    %c0_i32_1 = arith.constant 0 : i32
    return %c0_i32, %c0_i32_0 : i32, i32
  }
  func.func @transform_7(%arg0: i32) -> (i32, i32) {
    %c0_i32 = arith.constant 0 : i32
    %c0_i32_0 = arith.constant 0 : i32
    %c0_i32_1 = arith.constant 0 : i32
    return %c0_i32, %c0_i32_0 : i32, i32
  }
  func.func @transform_8(%arg0: i32) -> (i32, i32) {
    %c0_i32 = arith.constant 0 : i32
    %c0_i32_0 = arith.constant 0 : i32
    %c0_i32_1 = arith.constant 0 : i32
    return %c0_i32, %c0_i32_0 : i32, i32
  }
  func.func @transform_9(%arg0: i32) -> (i32, i32) {
    %c0_i32 = arith.constant 0 : i32
    %c0_i32_0 = arith.constant 0 : i32
    %c0_i32_1 = arith.constant 0 : i32
    return %c0_i32, %c0_i32_0 : i32, i32
  }
  func.func @transform_10(%arg0: i32) -> (i32, i32) {
    %c0_i32 = arith.constant 0 : i32
    %c0_i32_0 = arith.constant 0 : i32
    %c0_i32_1 = arith.constant 0 : i32
    return %c0_i32, %c0_i32_0 : i32, i32
  }
  func.func @transform_11(%arg0: i32) -> (i32, i32) {
    %c0_i32 = arith.constant 0 : i32
    %c0_i32_0 = arith.constant 0 : i32
    %c0_i32_1 = arith.constant 0 : i32
    return %c0_i32, %c0_i32_0 : i32, i32
  }
  func.func @transform_12(%arg0: i32) -> (i32, i32) {
    %c0_i32 = arith.constant 0 : i32
    %c0_i32_0 = arith.constant 0 : i32
    %c0_i32_1 = arith.constant 0 : i32
    return %c0_i32, %c0_i32_0 : i32, i32
  }
  func.func @transform_13(%arg0: i32) -> (i32, i32) {
    %c0_i32 = arith.constant 0 : i32
    %c0_i32_0 = arith.constant 0 : i32
    %c0_i32_1 = arith.constant 0 : i32
    return %c0_i32, %c0_i32_0 : i32, i32
  }
  func.func @transform_14(%arg0: i32) -> (i32, i32) {
    %c0_i32 = arith.constant 0 : i32
    %c0_i32_0 = arith.constant 0 : i32
    %c0_i32_1 = arith.constant 0 : i32
    return %c0_i32, %c0_i32_0 : i32, i32
  }
  func.func @transform_15(%arg0: i32) -> (i32, i32) {
    %c0_i32 = arith.constant 0 : i32
    %c0_i32_0 = arith.constant 0 : i32
    %c0_i32_1 = arith.constant 0 : i32
    return %c0_i32, %c0_i32_0 : i32, i32
  }
  func.func @transform_16(%arg0: i32) -> (i32, i32) {
    %c0_i32 = arith.constant 0 : i32
    %c0_i32_0 = arith.constant 0 : i32
    %c0_i32_1 = arith.constant 0 : i32
    return %c0_i32, %c0_i32_0 : i32, i32
  }
  func.func @transform_17(%arg0: i32) -> (i32, i32) {
    %c0_i32 = arith.constant 0 : i32
    %c0_i32_0 = arith.constant 0 : i32
    %c0_i32_1 = arith.constant 0 : i32
    return %c0_i32, %c0_i32_0 : i32, i32
  }
  func.func @transform_18(%arg0: i32) -> (i32, i32) {
    %c0_i32 = arith.constant 0 : i32
    %c0_i32_0 = arith.constant 0 : i32
    %c0_i32_1 = arith.constant 0 : i32
    return %c0_i32, %c0_i32_0 : i32, i32
  }
  func.func @transform_19(%arg0: i32) -> (i32, i32) {
    %c0_i32 = arith.constant 0 : i32
    %c0_i32_0 = arith.constant 0 : i32
    %c0_i32_1 = arith.constant 0 : i32
    return %c0_i32, %c0_i32_0 : i32, i32
  }
  func.func @transform_20(%arg0: i32) -> (i32, i32) {
    %c0_i32 = arith.constant 0 : i32
    %c0_i32_0 = arith.constant 0 : i32
    %c0_i32_1 = arith.constant 0 : i32
    return %c0_i32, %c0_i32_0 : i32, i32
  }
  func.func @transform_21(%arg0: i32) -> (i32, i32) {
    %c0_i32 = arith.constant 0 : i32
    %c0_i32_0 = arith.constant 0 : i32
    %c0_i32_1 = arith.constant 0 : i32
    return %c0_i32, %c0_i32_0 : i32, i32
  }
  func.func @transform_22(%arg0: i32) -> (i32, i32) {
    %c0_i32 = arith.constant 0 : i32
    %c0_i32_0 = arith.constant 0 : i32
    %c0_i32_1 = arith.constant 0 : i32
    return %c0_i32, %c0_i32_0 : i32, i32
  }
  func.func @transform_23(%arg0: i32) -> (i32, i32) {
    %c0_i32 = arith.constant 0 : i32
    %c0_i32_0 = arith.constant 0 : i32
    %c0_i32_1 = arith.constant 0 : i32
    return %c0_i32, %c0_i32_0 : i32, i32
  }
  func.func @transform_24(%arg0: i32) -> (i32, i32, i32) {
    %c0_i32 = arith.constant 0 : i32
    %c0_i32_0 = arith.constant 0 : i32
    %c0_i32_1 = arith.constant 0 : i32
    return %arg0, %c0_i32, %c0_i32_0 : i32, i32, i32
  }
  func.func @transform_25(%arg0: i32) -> (i32, i32, i32) {
    %c0_i32 = arith.constant 0 : i32
    %c0_i32_0 = arith.constant 0 : i32
    %c0_i32_1 = arith.constant 0 : i32
    return %arg0, %c0_i32, %c0_i32_0 : i32, i32, i32
  }
}

</mosaic_0001>

<bundles_post_ra>
// kernel: tpu_custom_call.1
= control target key start
LH: loop header
LB: loop body
LE: loop exit
PB: predicated region body
PF: predicated region fallthrough
CT: control target
= control target key end

     0   :  { %s2787_s0 = inlined_call_operand.vmem [shape: f32[2,8,128], index: 0, kind: input, shape index: {}]   ;;  %s2788_s1 = inlined_call_operand.vmem [shape: f32[2,1,8], index: 1, kind: input, shape index: {}]   ;;  %s2789_s2 = inlined_call_operand.vmem [shape: f32[1,128], index: 2, kind: input, shape index: {}]   ;;  %s2790_s3 = inlined_call_operand.vmem [shape: f32[1,128], index: 3, kind: input, shape index: {}]   ;;  %s2791_s4 = inlined_call_operand.hbm [shape: f32[128,384], index: 4, kind: input, shape index: {}]   ;;  %s2792_s5 = inlined_call_operand.vmem [shape: f32[1,384], index: 5, kind: input, shape index: {}]   ;;  %s2793_s6 = inlined_call_operand.vmem [shape: f32[128,128], index: 6, kind: input, shape index: {}]   ;;  %s2794_s7 = inlined_call_operand.vmem [shape: f32[1,128], index: 7, kind: input, shape index: {}]   ;;  %s2795_s8 = inlined_call_operand.vmem [shape: f32[1,128], index: 8, kind: input, shape index: {}]   ;;  %s2796_s9 = inlined_call_operand.vmem [shape: f32[1,128], index: 9, kind: input, shape index: {}]   ;;  %s2797_s10 = inlined_call_operand.hbm [shape: f32[128,256], index: 10, kind: input, shape index: {}]   ;;  %s2798_s11 = inlined_call_operand.vmem [shape: f32[1,256], index: 11, kind: input, shape index: {}]   ;;  %s2799_s12 = inlined_call_operand.hbm [shape: f32[256,128], index: 12, kind: input, shape index: {}]   ;;  %s2800_s13 = inlined_call_operand.vmem [shape: f32[1,128], index: 13, kind: input, shape index: {}]   ;;  %s2801_s14 = inlined_call_operand.vmem [shape: f32[1,128], index: 14, kind: input, shape index: {}]   ;;  %s2802_s15 = inlined_call_operand.vmem [shape: f32[1,128], index: 15, kind: input, shape index: {}]   ;;  %s2803_s16 = inlined_call_operand.vmem [shape: f32[128,64], index: 16, kind: input, shape index: {}]   ;;  %s2804_s17 = inlined_call_operand.vmem [shape: f32[1,64], index: 17, kind: input, shape index: {}]   ;;  %s2805_s18 = inlined_call_operand.vmem [shape: f32[64,10], index: 18, kind: input, shape index: {}]   ;;  %s2806_s19 = inlined_call_operand.vmem [shape: f32[1,10], index: 19, kind: input, shape index: {}]   ;;  %s2807_s20 = inlined_call_operand.vmem [shape: f32[10,128], index: 20, kind: input, shape index: {}]   ;;  %s2808_s21 = inlined_call_operand.vmem [shape: f32[1,128], index: 21, kind: input, shape index: {}]   ;;  %s2809_s22 = inlined_call_operand.vmem [shape: f32[1,10], index: 22, kind: input, shape index: {}]   ;;  %s2810_s23 = inlined_call_operand.vmem [shape: f32[10,10], index: 23, kind: input, shape index: {}]   ;;  %s2811_s24 = inlined_call_operand.hbm [shape: f32[2,1,128], index: 24, kind: output, shape index: {0}]   ;;  %s2812_s25 = inlined_call_operand.vmem [shape: f32[2,1,1], index: 25, kind: output, shape index: {1}]  }
   0x1   :  { %2825 = sst [smem:[#allocation19_spill]] %s2787_s0 }
   0x2   :  { %2826 = sst [smem:[#allocation20_spill]] %s2788_s1 }
   0x3   :  { %2827 = sst [smem:[#allocation21_spill]] %s2789_s2 }
   0x4   :  { %2828 = sst [smem:[#allocation22_spill]] %s2790_s3 }
   0x5   :  { %2829 = sst [smem:[#allocation23_spill]] %s2791_s4 }
   0x6   :  { %2830 = sst [smem:[#allocation24_spill]] %s2792_s5 }
   0x7   :  { %2831 = sst [smem:[#allocation25_spill]] %s2793_s6 }
   0x8   :  { %2832 = sst [smem:[#allocation26_spill]] %s2794_s7 }
   0x9   :  { %2833 = sst [smem:[#allocation27_spill]] %s2795_s8 }
   0xa   :  { %2834 = sst [smem:[#allocation28_spill]] %s2796_s9 }
   0xb   :  { %2835 = sst [smem:[#allocation29_spill]] %s2797_s10 }
   0xc   :  { %2836 = sst [smem:[#allocation30_spill]] %s2808_s21 }
   0xd   :  { %2837 = sst [smem:[#allocation31_spill]] %s2810_s23 }
   0xe   :  { %2838 = sst [smem:[#allocation32_spill]] %s2811_s24 }
   0xf   :  { %2839 = sst [smem:[#allocation33_spill]] %s2812_s25 }
  0x10   :  { %31 = vsyncpa [#allocation3], 0 }
  0x11   :  { %32 = vsyncpa [#allocation6], 0 }
  0x12   :  { %33 = vsyncpa [#allocation4], 0 }
  0x13   :  { %35 = vsyncpa [#allocation4 + $0x1], 0  ;;  %s2351_s29 = smov 0   ;;  %s2353_s2 = smov 0  }
  0x14   :  { %s2355_s6 = smov 0   ;;  %s2357_s30 = smov 0  }
  0x15 LB: > { %2840 = sst [smem:[#allocation12_spill]] %s2180_s29  ;;  %s2372_s7 = sadd.s32 4294967295, %s2192_s30   ;;  %s2192_s30 = sphi %s2357_s30, %s2872_s30   ;;  %s2188_s6 = sphi %s2355_s6, %s2874_s6   ;;  %s2184_s2 = sphi %s2353_s2, %s2876_s2   ;;  %s2180_s29 = sphi %s2351_s29, %s2875_s29  }
  0x16   : > { %2841 = sst [smem:[#allocation13_spill]] %s2188_s6  ;;  %s1884_s3 = sadd.s32 4294967294, %s2192_s30  }
  0x17   : > { %2842 = sst [smem:[#allocation14_spill]] %s2192_s30  ;;  %s2376_s26 = sadd.s32 1, %s2192_s30  }
  0x18   : > { %2843 = sst [smem:[#allocation15_spill]] %s2376_s26  ;;  %s562_s1 = sadd.s32 1, %s2188_s6 }
  0x19   : > { %s559_s8 = ssub.s32 %s2192_s30, %s2376_s26  ;;  %p572_p0 = scmp.ne.s32.totalorder %s2188_s6, %s2184_s2 }
  0x1a   : > { %p560_p1 = scmp.eq.s32.totalorder %s559_s8, 0  ;;  %p573_p2 = scmp.eq.s32.totalorder %s2372_s7, 1 }
  0x1b   : > { %p578_p3 = scmp.ne.s32.totalorder %s2184_s2, %s2180_s29  ;;  %p579_p4 = scmp.eq.s32.totalorder %s1884_s3, 1 }
  0x1c   : > { %s2387_s27 = scalar_select %p560_p1, %s2188_s6, %s562_s1  }
  0x1d   : > { %p2389_p5 = por %p573_p2, %p572_p0  ;;  %p2393_p6 = por %p579_p4, %p578_p3 }
  0x1e   : > { %2844 = sst [smem:[#allocation16_spill]] %s2387_s27  ;;  %p1885_p7 = scmp.ge.s32.totalorder %s2192_s30, 1 }
  0x1f   : > { %s2845_s4 = scalar_select %p2389_p5, 1, 0 }
  0x20   : > { %s2847_s28 = scalar_select %p2393_p6, 1, 0 }
  0x21   : > { %2846 = sst [smem:[#allocation17_spill]] %s2845_s4  ;;  %p612_p8 = scmp.lt.s32.totalorder %s2192_s30, 3 }
  0x22   : > { %2848 = sst [smem:[#allocation18_spill]] %s2847_s28  ;;  %p1934_p9 = scmp.eq.s32.totalorder %s2372_s7, 0 }
  0x23   : > { %p2400_p10 = pnand %p1885_p7, %p612_p8  ;;  %s2850_s10 = sld [smem:[#allocation29_spill]] }
  0x24   : > { %s2194_s1 = smov [#allocation5]   ;;  %s2852_s28 = sld [smem:[#allocation23_spill]] }
  0x25   : > { %p1920_p11 = pneg %p2400_p10  ;;  %s660_s8 = sshll.u32 %s2194_s1, 4  ;;  %s661_s8 = int_to_ptr.vmem [resolvable:$true] %s660_s8 }
  0x26   : > { %s2195_s5 = smov 256   ;;  %s2196_s0 = smov 16  }
  0x27   : > { %p2411_p12 = pnand %p1934_p9, %p1920_p11  ;;  %s2198_s30 = smov 384  }
  0x28   : > { %s2199_s25 = smov 24   ;;  %s675_s6 = sshll.u32 %s2799_s12, 4  ;;  %s676_s6 = int_to_ptr.hbm [resolvable:$true] %s675_s6 }
  0x29   : > { %s658_s3 = sshll.u32 %s2850_s10, 4  ;;  %s2197_s10 = smov [#allocation2]   ;;  %s659_s3 = int_to_ptr.hbm [resolvable:$true] %s658_s3 }
  0x2a   : > { %s629_s29 = sshll.u32 %s2852_s28, 4  ;;  %s631_s1 = sshll.u32 %s2197_s10, 4  ;;  %s630_s29 = int_to_ptr.hbm [resolvable:$true] %s629_s29  ;;  %s632_s1 = int_to_ptr.vmem [resolvable:$true] %s631_s1 }
  0x2b   : > { %1926 = dma.hbm_to_vmem [thread:$0]  (!%p2411_p12), %s659_s3, 4096, %s661_s8, [#allocation6], %s2195_s5, %s2195_s5, %s2196_s0  }
  0x2c   : > { %1923 = dma.hbm_to_vmem [thread:$0]  (!%p2411_p12), %s630_s29, 6144, %s632_s1, [#allocation3], %s2198_s30, %s2198_s30, %s2199_s25  }
  0x2d   : > { %s2200_s26 = smov [#allocation7]   ;;  %s2201_s23 = smov 128  }
  0x2e   : > { %s677_s28 = sshll.u32 %s2200_s26, 4  ;;  %s2202_s21 = smov 8   ;;  %s678_s28 = int_to_ptr.vmem [resolvable:$true] %s677_s28 }
  0x2f   : > { %1929 = dma.hbm_to_vmem [thread:$0]  (!%p2411_p12), %s676_s6, 4096, %s678_s28, [#allocation6], %s2201_s23, %s2201_s23, %s2202_s21  }
  0x30   : > { %739 = sbr.rel (%p2400_p10) target bundleno = 2837 (0xb15), region = 116 }
  0x35   : > { %2167 = dma.done.wait (%p1934_p9), [#allocation3], 6144  }
  0x36   : > { %2169 = vsyncadd (%p1934_p9), [#allocation3], 4294961152 }
  0x37   : > { %2171 = dma.done.wait (%p1934_p9), [#allocation6], 8192  }
  0x38   : > { %2173 = vsyncadd (%p1934_p9), [#allocation6], 4294959104  ;;  %p822_p13 = scmp.lt.s32.totalorder %s2372_s7, 1  ;;  %s2853_s25 = sld [smem:[#allocation19_spill]]  ;;  %v2203_v1 = vmov 128.0   ;;  %v915_v2 = vld [vmem:[#allocation2 + $0x168] sm:$0xff] }
  0x39   : > { %2012 = vrcp.f32 %v2203_v1  ;;  %v916_v3 = vld [vmem:[#allocation2 + $0x170] sm:$0xff]  ;;  %v917_v4 = vld [vmem:[#allocation2 + $0x178] sm:$0xff]  ;;  %926 = vmatpush.msra.mxu0 %v915_v2  ;;  %v914_v7 = vld [vmem:[#allocation2 + $0x160] sm:$0xff]  ;;  %s2854_s4 = sld [smem:[#allocation21_spill]]  ;;  %vm1012_vm4 = vcmask 64512   ;;  %vm1382_vm12 = vcmask 523264  }
  0x3a   : > { %s2439_s10 = scalar_select %p822_p13, %s2372_s7, 1  ;;  %946 = vmatpush.msra.mxu1 %v916_v3  ;;  %v912_v5 = vld [vmem:[#allocation2 + $0x150] sm:$0xff]  ;;  %v913_v6 = vld [vmem:[#allocation2 + $0x158] sm:$0xff]  ;;  %966 = vmatpush.msra.mxu2 %v917_v4  ;;  %v910_v19 = vld [vmem:[#allocation2 + $0x140] sm:$0xff]  ;;  %vm1413_vm13 = vcmask 1041408   ;;  %vm1409_vm14 = vcmask 80896  }
  0x3b   : > { %927 = vmatpush.msra.mxu0 %v912_v5  ;;  %v909_v18 = vld [vmem:[#allocation2 + $0x138] sm:$0xff]  ;;  %v911_v20 = vld [vmem:[#allocation2 + $0x148] sm:$0xff]  ;;  %v906_v21 = vld [vmem:[#allocation2 + $0x120] sm:$0xff]  ;;  %s2855_s8 = sld [smem:[#allocation22_spill]]  ;;  %s2213_s6 = smov 126  }
  0x3c   : > { %s1894_s21 = sshll.u32 %s2439_s10, 3  ;;  %947 = vmatpush.msra.mxu1 %v913_v6  ;;  %967 = vmatpush.msra.mxu2 %v914_v7  ;;  %v907_v22 = vld [vmem:[#allocation2 + $0x128] sm:$0xff]  ;;  %v908_v23 = vld [vmem:[#allocation2 + $0x130] sm:$0xff]  ;;  %v905_v26 = vld [vmem:[#allocation2 + $0x118] sm:$0xff]  ;;  %s2856_s1 = sld [smem:[#allocation24_spill]] }
  0x3d   : > { %928 = vmatpush.msra.mxu0 %v909_v18  ;;  %v903_v24 = vld [vmem:[#allocation2 + $0x108] sm:$0xff]  ;;  %v904_v25 = vld [vmem:[#allocation2 + $0x110] sm:$0xff]  ;;  %v901_v28 = vld [vmem:[#allocation2 + $0xf8] sm:$0xff]  ;;  %s2857_s28 = sld [smem:[#allocation20_spill]]  ;;  %s2214_s26 = smov 127  }
  0x3e   : > { %s825_s29 = scalar_lea.vmem %s2853_s25, %s1894_s21  ;;  %948 = vmatpush.msra.mxu1 %v910_v19  ;;  %968 = vmatpush.msra.mxu2 %v911_v20  ;;  %v900_v27 = vld [vmem:[#allocation2 + $0xf0] sm:$0xff]  ;;  %v902_v29 = vld [vmem:[#allocation2 + $0x100] sm:$0xff]  ;;  %v897_v30 = vld [vmem:[#allocation2 + $0xd8] sm:$0xff]  ;;  %s2858_s25 = sld [smem:[#allocation25_spill]] }
  0x3f   : > { %v832_v0 = vld [vmem:[%s825_s29] sm:$0xff]  ;;  %v2013_v8 = vpop.eup %2012  ;;  %929 = vmatpush.msra.mxu0 %v906_v21  ;;  %v899_v32 = vld [vmem:[#allocation2 + $0xe8] sm:$0xff]  ;;  %v896_v35 = vld [vmem:[#allocation2 + $0xd0] sm:$0xff]  ;;  %s2859_s29 = sld [smem:[#allocation26_spill]]  ;;  %s2217_s23 = smov 124  }
  0x40   : > { %833 = vadd.xlane.f32.xlu0 %v832_v0  ;;  %v836_v9 = vmul.f32 128.0, %v2013_v8  ;;  %vm840_vm0 = vweird.f32 %v2013_v8  ;;  %949 = vmatpush.msra.mxu1 %v907_v22  ;;  %v898_v31 = vld [vmem:[#allocation2 + $0xe0] sm:$0xff]  ;;  %v895_v34 = vld [vmem:[#allocation2 + $0xc8] sm:$0xff]  ;;  %v892_v37 = vld [vmem:[#allocation2 + $0xb0] sm:$0xff]  ;;  %s2218_s24 = smov 120   ;;  %s2220_s30 = smov 119  }
  0x41   : > { %969 = vmatpush.msra.mxu2 %v908_v23  ;;  %930 = vmatpush.msra.mxu0 %v903_v24  ;;  %v894_v33 = vld [vmem:[#allocation2 + $0xc0] sm:$0xff]  ;;  %v891_v36 = vld [vmem:[#allocation2 + $0xa8] sm:$0xff]  ;;  %v893_v38 = vld [vmem:[#allocation2 + $0xb8] sm:$0xff]  ;;  %s815_s27 = sand.u32 1, %s2184_s2   ;;  %s2864_s3 = sld [smem:[#allocation30_spill]] }
  0x42   : > { %v837_v10 = vsub.f32 1.0, %v836_v9  ;;  %950 = vmatpush.msra.mxu1 %v904_v25  ;;  %v888_v39 = vld [vmem:[#allocation2 + $0x90] sm:$0xff]  ;;  %v889_v40 = vld [vmem:[#allocation2 + $0x98] sm:$0xff]  ;;  %v890_v41 = vld [vmem:[#allocation2 + $0xa0] sm:$0xff]  ;;  %s1752_s9 = scalar_lea.sflag [#allocation4], %s815_s27 }
  0x43   : > { %970 = vmatpush.msra.mxu2 %v905_v26  ;;  %931 = vmatpush.msra.mxu0 %v900_v27  ;;  %v885_v42 = vld [vmem:[#allocation2 + $0x78] sm:$0xff]  ;;  %v886_v43 = vld [vmem:[#allocation2 + $0x80] sm:$0xff]  ;;  %v887_v44 = vld [vmem:[#allocation2 + $0x88] sm:$0xff]  ;;  %s828_s21 = scalar_lea.vmem %s2857_s28, %s2439_s10  ;;  %s2215_s28 = smov 121  }
  0x44   : > { %v838_v11 = vmul.f32 %v2013_v8, %v837_v10  ;;  %951 = vmatpush.msra.mxu1 %v901_v28  ;;  %v882_v45 = vld [vmem:[#allocation2 + $0x60] sm:$0xff]  ;;  %v883_v46 = vld [vmem:[#allocation2 + $0x68] sm:$0xff]  ;;  %v884_v47 = vld [vmem:[#allocation2 + $0x70] sm:$0xff] }
  0x45   : > { %971 = vmatpush.msra.mxu2 %v902_v29  ;;  %932 = vmatpush.msra.mxu0 %v897_v30  ;;  %v879_v48 = vld [vmem:[#allocation2 + $0x48] sm:$0xff]  ;;  %v880_v49 = vld [vmem:[#allocation2 + $0x50] sm:$0xff]  ;;  %v881_v50 = vld [vmem:[#allocation2 + $0x58] sm:$0xff] }
  0x46   : > { %v839_v12 = vadd.f32 %v2013_v8, %v838_v11  ;;  %952 = vmatpush.msra.mxu1 %v898_v31  ;;  %v876_v51 = vld [vmem:[#allocation2 + $0x30] sm:$0xff]  ;;  %v877_v52 = vld [vmem:[#allocation2 + $0x38] sm:$0xff]  ;;  %v878_v53 = vld [vmem:[#allocation2 + $0x40] sm:$0xff] }
  0x47   : > { %972 = vmatpush.msra.mxu2 %v899_v32  ;;  %933 = vmatpush.msra.mxu0 %v894_v33  ;;  %v873_v54 = vld [vmem:[#allocation2 + $0x18] sm:$0xff]  ;;  %v874_v55 = vld [vmem:[#allocation2 + $0x20] sm:$0xff]  ;;  %v875_v56 = vld [vmem:[#allocation2 + $0x28] sm:$0xff] }
  0x48   : > { %v2445_v13 = vsel %vm840_vm0, %v2013_v8, %v839_v12  ;;  %953 = vmatpush.msra.mxu1 %v895_v34  ;;  %v870_v57 = vld [vmem:[#allocation2] sm:$0xff]  ;;  %v871_v58 = vld [vmem:[#allocation2 + $0x8] sm:$0xff]  ;;  %v872_v59 = vld [vmem:[#allocation2 + $0x10] sm:$0xff] }
  0x49   : > { %973 = vmatpush.msra.mxu2 %v896_v35  ;;  %934 = vmatpush.msra.mxu0 %v891_v36  ;;  %v2003_v5 = vld [vmem:[%s2854_s4] ss:$0 sm:$0xff]  ;;  %v1062_v32 = vld [vmem:[%s2858_s25 + $0x78] sm:$0xff]  ;;  %v1061_v33 = vld [vmem:[%s2858_s25 + $0x70] sm:$0xff]  ;;  %s2860_s4 = sld [smem:[#allocation27_spill]] }
  0x4a   : > { %954 = vmatpush.msra.mxu1 %v892_v37  ;;  %v2004_v8 = vld [vmem:[%s2855_s8] ss:$0 sm:$0xff]  ;;  %v1060_v34 = vld [vmem:[%s2858_s25 + $0x68] sm:$0xff]  ;;  %v1058_v36 = vld [vmem:[%s2858_s25 + $0x58] sm:$0xff]  ;;  %s2861_s8 = sld [smem:[#allocation28_spill]] }
  0x4b   : > { %974 = vmatpush.msra.mxu2 %v893_v38  ;;  %935 = vmatpush.msra.mxu0 %v888_v39  ;;  %v918_v11 = vld [vmem:[%s2856_s1] sm:$0x7]  ;;  %v1057_v37 = vld [vmem:[%s2858_s25 + $0x50] sm:$0xff]  ;;  %v1056_v38 = vld [vmem:[%s2858_s25 + $0x48] sm:$0xff]  ;;  %s2212_s1 = smov 125  }
  0x4c   : > { %955 = vmatpush.msra.mxu1 %v889_v40  ;;  %v921_v12 = vperm.slane %v918_v11, 1  ;;  %v922_v19 = vperm.slane %v918_v11, 2  ;;  %v2005_v22 = vld [vmem:[%s828_s21] ss:$0 sm:$0xff]  ;;  %v1054_v40 = vld [vmem:[%s2858_s25 + $0x38] sm:$0xff]  ;;  %s2216_s21 = smov 123  }
  0x4d   : > { %975 = vmatpush.msra.mxu2 %v890_v41  ;;  %936 = vmatpush.msra.mxu0 %v885_v42  ;;  %v1059_v35 = vld [vmem:[%s2858_s25 + $0x60] sm:$0xff]  ;;  %v1053_v41 = vld [vmem:[%s2858_s25 + $0x30] sm:$0xff]  ;;  %v1052_v42 = vld [vmem:[%s2858_s25 + $0x28] sm:$0xff] }
  0x4e   : > { %956 = vmatpush.msra.mxu1 %v886_v43  ;;  %v1055_v39 = vld [vmem:[%s2858_s25 + $0x40] sm:$0xff] }
  0x4f   : > { %976 = vmatpush.msra.mxu2 %v887_v44  ;;  %937 = vmatpush.msra.mxu0 %v882_v45  ;;  %v1051_v43 = vld [vmem:[%s2858_s25 + $0x20] sm:$0xff]  ;;  %v1050_v45 = vld [vmem:[%s2858_s25 + $0x18] sm:$0xff] }
  0x50   : > { %957 = vmatpush.msra.mxu1 %v883_v46  ;;  %v1049_v46 = vld [vmem:[%s2858_s25 + $0x10] sm:$0xff] }
  0x51   : > { %977 = vmatpush.msra.mxu2 %v884_v47  ;;  %938 = vmatpush.msra.mxu0 %v879_v48  ;;  %v1048_v47 = vld [vmem:[%s2858_s25 + $0x8] sm:$0xff] }
  0x52   : > { %958 = vmatpush.msra.mxu1 %v880_v49 }
  0x53   : > { %978 = vmatpush.msra.mxu2 %v881_v50  ;;  %939 = vmatpush.msra.mxu0 %v876_v51  ;;  %v1047_v50 = vld [vmem:[%s2858_s25] sm:$0xff] }
  0x54   : > { %959 = vmatpush.msra.mxu1 %v877_v52  ;;  %v2006_v52 = vld [vmem:[%s2859_s29] ss:$0 sm:$0xff]  ;;  %s2219_s29 = smov 122  }
  0x55   : > { %979 = vmatpush.msra.mxu2 %v878_v53  ;;  %940 = vmatpush.msra.mxu0 %v873_v54 }
  0x56   : > { %960 = vmatpush.msra.mxu1 %v874_v55 }
  0x57   : > { %980 = vmatpush.msra.mxu2 %v875_v56  ;;  %941 = vmatpush.msra.mxu0 %v870_v57  ;;  %v1148_v56 = vld [vmem:[#allocation5 + $0xf0] sm:$0xff]  ;;  %v1149_v57 = vld [vmem:[#allocation5 + $0xf8] sm:$0xff] }
  0x58   : > { %961 = vmatpush.msra.mxu1 %v871_v58  ;;  %v1146_v58 = vld [vmem:[#allocation5 + $0xe0] sm:$0xff] }
  0x59   : > { %981 = vmatpush.msra.mxu2 %v872_v59  ;;  %1156 = vmatpush.msrb.mxu0 %v1148_v56  ;;  %v1147_v59 = vld [vmem:[#allocation5 + $0xe8] sm:$0xff] }
  0x5a   : > { %1176 = vmatpush.msrb.mxu1 %v1149_v57  ;;  %v1223_v56 = vld [vmem:[#allocation7 + $0x48] sm:$0xff] }
  0x5b   : > { %1157 = vmatpush.msrb.mxu0 %v1146_v58  ;;  %v1239_v57 = vld [vmem:[#allocation7 + $0xc8] sm:$0xff]  ;;  %v1222_v58 = vld [vmem:[#allocation7 + $0x40] sm:$0xff] }
  0x5c   : > { %1177 = vmatpush.msrb.mxu1 %v1147_v59  ;;  %v1238_v59 = vld [vmem:[#allocation7 + $0xc0] sm:$0xff] }
  0xb3   : > { %v834_v14 = vpop.xlane.xlu0 %833 }
  0xb4   : > { %v842_v15 = vmul.f32 %v2445_v13, %v834_v14  ;;  %v920_v14 = vperm.slane %v918_v11, 0  ;;  %v1135_v11 = vld [vmem:[#allocation5 + $0x88] sm:$0xff] }
  0xb6   : > { %v2448_v16 = vsub.f32 %v832_v0, %v842_v15 }
  0xb8   : > { %v844_v17 = vmul.f32 %v2448_v16, %v2448_v16 }
  0xba   : > { %845 = vadd.xlane.f32.xlu0 %v844_v17 }
 0x12d   : > { %v846_v60 = vpop.xlane.xlu0 %845 }
 0x12e   : > { %v847_v61 = vmul.f32 %v846_v60, %v2445_v13 }
 0x130   : > { %v848_v62 = vadd.f32 1e-12, %v847_v61 }
 0x132   : > { %2014 = vrsqrt.f32 %v848_v62  ;;  %vm855_vm2 = vweird.f32 %v848_v62 }
 0x138   : > { %v2015_v63 = vpop.eup %2014 }
 0x139   : > { %v850_v0 = vmul.f32 %v2015_v63, %v848_v62  ;;  %vm856_vm1 = vweird.f32 %v2015_v63 }
 0x13a   : > { %vm857_vm3 = vmor %vm855_vm2, %vm856_vm1 }
 0x13b   : > { %v851_v1 = vmul.f32 %v2015_v63, %v850_v0  ;;  %v1144_v0 = vld [vmem:[#allocation5 + $0xd0] sm:$0xff] }
 0x13c   : > { %1158 = vmatpush.msrb.mxu0 %v1144_v0  ;;  %v1219_v0 = vld [vmem:[#allocation7 + $0x28] sm:$0xff] }
 0x13d   : > { %v852_v2 = vmul.f32 0.5, %v851_v1  ;;  %v1145_v1 = vld [vmem:[#allocation5 + $0xd8] sm:$0xff] }
 0x13e   : > { %1178 = vmatpush.msrb.mxu1 %v1145_v1  ;;  %v1235_v1 = vld [vmem:[#allocation7 + $0xa8] sm:$0xff] }
 0x13f   : > { %v853_v3 = vsub.f32 1.5, %v852_v2  ;;  %v1142_v2 = vld [vmem:[#allocation5 + $0xc0] sm:$0xff] }
 0x140   : > { %1159 = vmatpush.msrb.mxu0 %v1142_v2  ;;  %v1218_v2 = vld [vmem:[#allocation7 + $0x20] sm:$0xff] }
 0x141   : > { %v854_v4 = vmul.f32 %v2015_v63, %v853_v3  ;;  %v1143_v3 = vld [vmem:[#allocation5 + $0xc8] sm:$0xff] }
 0x142   : > { %1179 = vmatpush.msrb.mxu1 %v1143_v3  ;;  %v1234_v3 = vld [vmem:[#allocation7 + $0xa0] sm:$0xff] }
 0x143   : > { %v858_v6 = vsel %vm857_vm3, %v2015_v63, %v854_v4  ;;  %v1140_v4 = vld [vmem:[#allocation5 + $0xb0] sm:$0xff] }
 0x144   : > { %v859_v7 = vmul.f32 %v858_v6, %v2448_v16  ;;  %1160 = vmatpush.msrb.mxu0 %v1140_v4  ;;  %v1138_v6 = vld [vmem:[#allocation5 + $0xa0] sm:$0xff]  ;;  %v1217_v4 = vld [vmem:[#allocation7 + $0x18] sm:$0xff] }
 0x146   : > { %v864_v9 = vmul.f32 %v2003_v5, %v859_v7  ;;  %v1141_v5 = vld [vmem:[#allocation5 + $0xb8] sm:$0xff]  ;;  %v1139_v7 = vld [vmem:[#allocation5 + $0xa8] sm:$0xff]  ;;  %1161 = vmatpush.msrb.mxu0 %v1138_v6  ;;  %v1216_v6 = vld [vmem:[#allocation7 + $0x10] sm:$0xff] }
 0x147   : > { %1180 = vmatpush.msrb.mxu1 %v1141_v5  ;;  %v1233_v5 = vld [vmem:[#allocation7 + $0x98] sm:$0xff] }
 0x148   : > { %v2460_v10 = vadd.f32 %v2004_v8, %v864_v9  ;;  %v1136_v8 = vld [vmem:[#allocation5 + $0x90] sm:$0xff]  ;;  %v1137_v9 = vld [vmem:[#allocation5 + $0x98] sm:$0xff] }
 0x149   : > { %1181 = vmatpush.msrb.mxu1 %v1139_v7  ;;  %1162 = vmatpush.msrb.mxu0 %v1136_v8  ;;  %v1232_v7 = vld [vmem:[#allocation7 + $0x90] sm:$0xff]  ;;  %v1215_v8 = vld [vmem:[#allocation7 + $0x8] sm:$0xff] }
 0x14a   : > { %942 = vmatmul.f32.vlgmr.msra.gmra.mxu0 %v2460_v10  ;;  %962 = vmatmul.f32.vlgmr.msra.gmra.mxu1 %v2460_v10 }
 0x14b   : > { %982 = vmatmul.f32.vlgmr.msra.gmra.mxu2 %v2460_v10  ;;  %1182 = vmatpush.msrb.mxu1 %v1137_v9  ;;  %v1231_v9 = vld [vmem:[#allocation7 + $0x88] sm:$0xff] }
 0x14d   : > { %1183 = vmatpush.msrb.mxu1 %v1135_v11  ;;  %v1230_v11 = vld [vmem:[#allocation7 + $0x80] sm:$0xff] }
 0x1c7   : > { %v963_v15 = vpop.f32.mrf.mxu1  ;;  %v943_v16 = vpop.f32.mrf.mxu0 }
 0x1c8   : > { %v964_v17 = vadd.f32 %v963_v15, %v921_v12  ;;  %v944_v18 = vadd.f32 %v943_v16, %v920_v14  ;;  %v1132_v12 = vld [vmem:[#allocation5 + $0x70] sm:$0xff]  ;;  %v1133_v14 = vld [vmem:[#allocation5 + $0x78] sm:$0xff]  ;;  %v1130_v15 = vld [vmem:[#allocation5 + $0x60] sm:$0xff] }
 0x1c9   : > { %1184 = vmatpush.msrb.mxu1 %v1133_v14  ;;  %v1131_v16 = vld [vmem:[#allocation5 + $0x68] sm:$0xff] }
 0x1ca   : > { %1001 = vmatpush.xpose.msra.mxu3 %v964_v17  ;;  %v1128_v17 = vld [vmem:[#allocation5 + $0x50] sm:$0xff] }
 0x1cb   : > { %1185 = vmatpush.msrb.mxu1 %v1131_v16 }
 0x1cd   : > { %1002 = vmatmul.f32.vlgmr.msra.gmra.mxu3 %v944_v18  ;;  %v1129_v18 = vld [vmem:[#allocation5 + $0x58] sm:$0xff] }
 0x1ce   : > { %v983_v20 = vpop.f32.mrf.mxu2  ;;  %1186 = vmatpush.msrb.mxu1 %v1129_v18 }
 0x1cf   : > { %v984_v21 = vadd.f32 %v983_v20, %v922_v19  ;;  %v1126_v19 = vld [vmem:[#allocation5 + $0x40] sm:$0xff]  ;;  %v1127_v20 = vld [vmem:[#allocation5 + $0x48] sm:$0xff] }
 0x1d0   : > { %1187 = vmatpush.msrb.mxu1 %v1127_v20 }
 0x1d1   : > { %1042 = vmatpush.msrb.mxu3 %v984_v21  ;;  %v1124_v21 = vld [vmem:[#allocation5 + $0x30] sm:$0xff] }
 0x1d3   : > { %1067 = vmatpush.msra.mxu3 %v1062_v32  ;;  %v1244_v32 = vld [vmem:[#allocation7 + $0xf0] sm:$0xff] }
 0x1d5   : > { %1068 = vmatpush.msra.mxu3 %v1061_v33  ;;  %v1227_v33 = vld [vmem:[#allocation7 + $0x68] sm:$0xff] }
 0x1d7   : > { %1069 = vmatpush.msra.mxu3 %v1060_v34  ;;  %v1243_v34 = vld [vmem:[#allocation7 + $0xe8] sm:$0xff] }
 0x1d9   : > { %1070 = vmatpush.msra.mxu3 %v1059_v35 }
 0x1db   : > { %1071 = vmatpush.msra.mxu3 %v1058_v36 }
 0x1dd   : > { %1072 = vmatpush.msra.mxu3 %v1057_v37 }
 0x1df   : > { %1073 = vmatpush.msra.mxu3 %v1056_v38 }
 0x1e1   : > { %1074 = vmatpush.msra.mxu3 %v1055_v39 }
 0x1e3   : > { %1075 = vmatpush.msra.mxu3 %v1054_v40 }
 0x1e5   : > { %1076 = vmatpush.msra.mxu3 %v1053_v41 }
 0x1e7   : > { %1077 = vmatpush.msra.mxu3 %v1052_v42 }
 0x1e9   : > { %1078 = vmatpush.msra.mxu3 %v1051_v43 }
 0x1eb   : > { %1079 = vmatpush.msra.mxu3 %v1050_v45 }
 0x1ed   : > { %1080 = vmatpush.msra.mxu3 %v1049_v46 }
 0x1ef   : > { %1081 = vmatpush.msra.mxu3 %v1048_v47  ;;  %v2008_v47 = vld [vmem:[%s2861_s8] ss:$0 sm:$0xff]  ;;  %s2734_s8 = scalar_lea.vmem [#allocation8], %s815_s27 }
 0x1f1   : > { %1082 = vmatpush.msra.mxu3 %v1047_v50  ;;  %v1226_v50 = vld [vmem:[#allocation7 + $0x60] sm:$0xff] }
 0x250   : > { %v1003_v23 = vpop.f32.mrf.mxu3 }
 0x251   : > { %v1006_v24 = vmul.f32 0.088388346, %v1003_v23  ;;  %v1122_v23 = vld [vmem:[#allocation5 + $0x20] sm:$0xff] }
 0x253   : > { %v1011_v25 = vadd.f32 %v2005_v22, %v1006_v24  ;;  %v1125_v22 = vld [vmem:[#allocation5 + $0x38] sm:$0xff]  ;;  %v1123_v24 = vld [vmem:[#allocation5 + $0x28] sm:$0xff] }
 0x254   : > { %1188 = vmatpush.msrb.mxu1 %v1125_v22 }
 0x255   : > { %v1013_v26 = vsel %vm1012_vm4, %v1011_v25, -inf }
 0x256   : > { %1014 = vmax.xlane.f32.xlu1 %v1013_v26  ;;  %v1121_v26 = vld [vmem:[#allocation5 + $0x18] sm:$0xff]  ;;  %1189 = vmatpush.msrb.mxu1 %v1123_v24 }
 0x258   : > { %1190 = vmatpush.msrb.mxu1 %v1121_v26 }
 0x2c9   : > { %v1015_v27 = vpop.xlane.xlu1 %1014 }
 0x2ca   : > { %v1016_v28 = vsub.f32 %v1011_v25, %v1015_v27  ;;  %v1120_v25 = vld [vmem:[#allocation5 + $0x10] sm:$0xff]  ;;  %v1118_v27 = vld [vmem:[#allocation5] sm:$0xff] }
 0x2cc   : > { %v1017_v29 = vmul.f32 1.442695, %v1016_v28  ;;  %v1119_v28 = vld [vmem:[#allocation5 + $0x8] sm:$0xff] }
 0x2cd   : > { %1191 = vmatpush.msrb.mxu1 %v1119_v28 }
 0x2ce   : > { %2016 = vpow2.f32 %v1017_v29  ;;  %v1229_v29 = vld [vmem:[#allocation7 + $0x78] sm:$0xff] }
 0x2cf   : > { %1250 = vmatpush.msrb.mxu2 %v1229_v29 }
 0x2d4   : > { %v2017_v30 = vpop.eup %2016 }
 0x2d5   : > { %v1019_v31 = vsel %vm1012_vm4, %v2017_v30, 0.0 }
 0x2d6   : > { %1020 = vadd.xlane.f32.xlu1 %v1019_v31  ;;  %v1228_v31 = vld [vmem:[#allocation7 + $0x70] sm:$0xff] }
 0x2d7   : > { %1251 = vmatpush.msrb.mxu2 %v1228_v31 }
 0x2d9   : > { %1252 = vmatpush.msrb.mxu2 %v1227_v33 }
 0x2db   : > { %1253 = vmatpush.msrb.mxu2 %v1226_v50  ;;  %v1349_v50 = vld [vmem:[%s2803_s16 + $0x70] sm:$0xff] }
 0x349   : > { %v1021_v44 = vpop.xlane.xlu1 %1020 }
 0x34a   : > { %2018 = vrcp.f32 %v1021_v44  ;;  %v2007_v44 = vld [vmem:[%s2860_s4] ss:$0 sm:$0xff] }
 0x350   : > { %v2019_v48 = vpop.eup %2018 }
 0x351   : > { %v1023_v49 = vmul.f32 %v2019_v48, %v2017_v30  ;;  %v1245_v30 = vld [vmem:[#allocation7 + $0xf8] sm:$0xff] }
 0x353   : > { %1895 = vmatmul.msk.f32.vlgmr.msrb.gmra.mxu3 %vm1012_vm4, %v1023_v49 }
 0x354   : > { %1270 = vmatpush.msrb.mxu3 %v1245_v30 }
 0x356   : > { %1271 = vmatpush.msrb.mxu3 %v1244_v32 }
 0x358   : > { %1272 = vmatpush.msrb.mxu3 %v1243_v34 }
 0x3d6   : > { %v1044_v51 = vpop.f32.mrf.mxu3 }
 0x3d7   : > { %1083 = vmatmul.f32.vlgmr.msra.gmra.mxu3 %v1044_v51  ;;  %v1242_v51 = vld [vmem:[#allocation7 + $0xe0] sm:$0xff] }
 0x3d8   : > { %1273 = vmatpush.msrb.mxu3 %v1242_v51  ;;  %v1347_v51 = vld [vmem:[%s2803_s16 + $0x60] sm:$0xff] }
 0x45a   : > { %v1084_v53 = vpop.f32.mrf.mxu3 }
 0x45b   : > { %v1085_v54 = vadd.f32 %v2006_v52, %v1084_v53  ;;  %v1225_v52 = vld [vmem:[#allocation7 + $0x58] sm:$0xff] }
 0x45c   : > { %v1241_v53 = vld [vmem:[#allocation7 + $0xd8] sm:$0xff]  ;;  %1254 = vmatpush.msrb.mxu2 %v1225_v52 }
 0x45d   : > { %v1087_v55 = vadd.f32 %v1085_v54, %v2460_v10  ;;  %v1134_v10 = vld [vmem:[#allocation5 + $0x80] sm:$0xff]  ;;  %1274 = vmatpush.msrb.mxu3 %v1241_v53  ;;  %v1224_v54 = vld [vmem:[#allocation7 + $0x50] sm:$0xff]  ;;  %v1346_v52 = vld [vmem:[%s2803_s16 + $0x58] sm:$0xff] }
 0x45e   : > { %1163 = vmatpush.msrb.mxu0 %v1134_v10  ;;  %1255 = vmatpush.msrb.mxu2 %v1224_v54  ;;  %v1214_v10 = vld [vmem:[#allocation7] sm:$0xff]  ;;  %v1345_v53 = vld [vmem:[%s2803_s16 + $0x50] sm:$0xff]  ;;  %v1344_v54 = vld [vmem:[%s2803_s16 + $0x48] sm:$0xff] }
 0x45f   : > { %1088 = vadd.xlane.f32.xlu2 %v1087_v55 }
 0x460   : > { %1164 = vmatpush.msrb.mxu0 %v1132_v12  ;;  %1256 = vmatpush.msrb.mxu2 %v1223_v56  ;;  %v1150_v12 = vld [vmem:[%s2798_s11] sm:$0x3]  ;;  %v1342_v56 = vld [vmem:[%s2803_s16 + $0x38] sm:$0xff] }
 0x461   : > { %v1152_v14 = vperm.slane %v1150_v12, 0 }
 0x462   : > { %1165 = vmatpush.msrb.mxu0 %v1130_v15  ;;  %1257 = vmatpush.msrb.mxu2 %v1222_v58  ;;  %v1153_v15 = vperm.slane %v1150_v12, 1  ;;  %v1340_v58 = vld [vmem:[%s2803_s16 + $0x28] sm:$0xff] }
 0x464   : > { %1166 = vmatpush.msrb.mxu0 %v1128_v17 }
 0x466   : > { %1167 = vmatpush.msrb.mxu0 %v1126_v19 }
 0x468   : > { %1168 = vmatpush.msrb.mxu0 %v1124_v21 }
 0x46a   : > { %1169 = vmatpush.msrb.mxu0 %v1122_v23 }
 0x46c   : > { %1170 = vmatpush.msrb.mxu0 %v1120_v25 }
 0x46e   : > { %1171 = vmatpush.msrb.mxu0 %v1118_v27 }
 0x4d2   : > { %v1089_v60 = vpop.xlane.xlu2 %1088 }
 0x4d3   : > { %v1090_v61 = vmul.f32 %v1089_v60, %v2445_v13  ;;  %v1221_v60 = vld [vmem:[#allocation7 + $0x38] sm:$0xff] }
 0x4d4   : > { %1258 = vmatpush.msrb.mxu2 %v1221_v60 }
 0x4d5   : > { %v2528_v62 = vsub.f32 %v1087_v55, %v1090_v61  ;;  %v1240_v55 = vld [vmem:[#allocation7 + $0xd0] sm:$0xff]  ;;  %v1237_v61 = vld [vmem:[#allocation7 + $0xb8] sm:$0xff] }
 0x4d6   : > { %1275 = vmatpush.msrb.mxu3 %v1240_v55  ;;  %v1343_v55 = vld [vmem:[%s2803_s16 + $0x40] sm:$0xff] }
 0x4d7   : > { %v1092_v63 = vmul.f32 %v2528_v62, %v2528_v62 }
 0x4d8   : > { %1276 = vmatpush.msrb.mxu3 %v1239_v57  ;;  %v1341_v57 = vld [vmem:[%s2803_s16 + $0x30] sm:$0xff] }
 0x4d9   : > { %1093 = vadd.xlane.f32.xlu2 %v1092_v63  ;;  %v1236_v63 = vld [vmem:[#allocation7 + $0xb0] sm:$0xff] }
 0x4da   : > { %1277 = vmatpush.msrb.mxu3 %v1238_v59  ;;  %v1339_v59 = vld [vmem:[%s2803_s16 + $0x20] sm:$0xff] }
 0x4dc   : > { %1278 = vmatpush.msrb.mxu3 %v1237_v61 }
 0x4de   : > { %1279 = vmatpush.msrb.mxu3 %v1236_v63 }
 0x4e0   : > { %1280 = vmatpush.msrb.mxu3 %v1235_v1  ;;  %v1336_v1 = vld [vmem:[%s2803_s16 + $0x8] sm:$0xff] }
 0x4e2   : > { %1281 = vmatpush.msrb.mxu3 %v1234_v3  ;;  %v1380_v3 = vld [vmem:[%s2805_s18 + $0x38] sm:$0xff] }
 0x4e3   : > { %1394 = vmatpush.msra.mxu1 %v1380_v3  ;;  %v2209_v3 = vmov 2102212464  }
 0x4e4   : > { %1282 = vmatpush.msrb.mxu3 %v1233_v5 }
 0x4e6   : > { %1283 = vmatpush.msrb.mxu3 %v1232_v7  ;;  %v1378_v7 = vld [vmem:[%s2805_s18 + $0x28] sm:$0xff] }
 0x4e8   : > { %1284 = vmatpush.msrb.mxu3 %v1231_v9  ;;  %v1377_v9 = vld [vmem:[%s2805_s18 + $0x20] sm:$0xff] }
 0x4ea   : > { %1285 = vmatpush.msrb.mxu3 %v1230_v11  ;;  %v1376_v11 = vld [vmem:[%s2805_s18 + $0x18] sm:$0xff] }
 0x54c   : > { %v1094_v35 = vpop.xlane.xlu2 %1093 }
 0x54d   : > { %v1095_v36 = vmul.f32 %v1094_v35, %v2445_v13 }
 0x54f   : > { %v1096_v37 = vadd.f32 1e-12, %v1095_v36 }
 0x551   : > { %2020 = vrsqrt.f32 %v1096_v37  ;;  %vm1103_vm6 = vweird.f32 %v1096_v37 }
 0x557   : > { %v2021_v38 = vpop.eup %2020 }
 0x558   : > { %v1098_v39 = vmul.f32 %v2021_v38, %v1096_v37  ;;  %vm1104_vm5 = vweird.f32 %v2021_v38 }
 0x559   : > { %vm1105_vm7 = vmor %vm1103_vm6, %vm1104_vm5 }
 0x55a   : > { %v1099_v40 = vmul.f32 %v2021_v38, %v1098_v39 }
 0x55c   : > { %v1100_v41 = vmul.f32 0.5, %v1099_v40 }
 0x55e   : > { %v1101_v42 = vsub.f32 1.5, %v1100_v41 }
 0x560   : > { %v1102_v43 = vmul.f32 %v2021_v38, %v1101_v42 }
 0x562   : > { %v1106_v45 = vsel %vm1105_vm7, %v2021_v38, %v1102_v43  ;;  %v2009_v38 = vld [vmem:[%s2800_s13] ss:$0 sm:$0xff] }
 0x563   : > { %v1107_v46 = vmul.f32 %v1106_v45, %v2528_v62  ;;  %v1220_v62 = vld [vmem:[#allocation7 + $0x30] sm:$0xff] }
 0x564   : > { %1259 = vmatpush.msrb.mxu2 %v1220_v62  ;;  %v1338_v62 = vld [vmem:[%s2803_s16 + $0x18] sm:$0xff] }
 0x565   : > { %v1112_v48 = vmul.f32 %v2007_v44, %v1107_v46 }
 0x566   : > { %1260 = vmatpush.msrb.mxu2 %v1219_v0  ;;  %v1337_v0 = vld [vmem:[%s2803_s16 + $0x10] sm:$0xff] }
 0x567   : > { %v2540_v49 = vadd.f32 %v2008_v47, %v1112_v48  ;;  %v1350_v48 = vld [vmem:[%s2803_s16 + $0x78] sm:$0xff] }
 0x568   : > { %1261 = vmatpush.msrb.mxu2 %v1218_v2  ;;  %1352 = vmatpush.msra.mxu0 %v1350_v48 }
 0x569   : > { %1172 = vmatmul.f32.vlgmr.msrb.gmra.mxu0 %v2540_v49  ;;  %1192 = vmatmul.f32.vlgmr.msrb.gmra.mxu1 %v2540_v49 }
 0x56a   : > { %1262 = vmatpush.msrb.mxu2 %v1217_v4  ;;  %1353 = vmatpush.msra.mxu0 %v1349_v50  ;;  %v1379_v4 = vld [vmem:[%s2805_s18 + $0x30] sm:$0xff] }
 0x56b   : > { %1395 = vmatpush.msra.mxu1 %v1379_v4 }
 0x56c   : > { %1263 = vmatpush.msrb.mxu2 %v1216_v6  ;;  %v2204_v6 = vmov 8.0  }
 0x56d   : > { %1396 = vmatpush.msra.mxu1 %v1378_v7 }
 0x56e   : > { %1264 = vmatpush.msrb.mxu2 %v1215_v8 }
 0x56f   : > { %1397 = vmatpush.msra.mxu1 %v1377_v9  ;;  %v2211_v9 = vmov 1326507024  }
 0x570   : > { %1265 = vmatpush.msrb.mxu2 %v1214_v10 }
 0x571   : > { %1398 = vmatpush.msra.mxu1 %v1376_v11 }
 0x5e6   : > { %v1173_v16 = vpop.f32.mrf.mxu0  ;;  %v1193_v17 = vpop.f32.mrf.mxu1 }
 0x5e7   : > { %v1174_v18 = vadd.f32 %v1173_v16, %v1152_v14  ;;  %v1194_v19 = vadd.f32 %v1193_v17, %v1153_v15  ;;  %v2010_v16 = vld [vmem:[%s2801_s14] ss:$0 sm:$0xff] }
 0x5e9   : > { %v1196_v20 = vmul.f32 %v1174_v18, %v1174_v18  ;;  %v1197_v21 = vmul.f32 %v1194_v19, %v1194_v19 }
 0x5eb   : > { %v1198_v22 = vmul.f32 %v1196_v20, %v1174_v18  ;;  %v1199_v23 = vmul.f32 %v1197_v21, %v1194_v19 }
 0x5ed   : > { %v1200_v24 = vmul.f32 0.044715, %v1198_v22  ;;  %v1201_v25 = vmul.f32 0.044715, %v1199_v23 }
 0x5ef   : > { %v1202_v26 = vadd.f32 %v1200_v24, %v1174_v18  ;;  %v1203_v27 = vadd.f32 %v1201_v25, %v1194_v19 }
 0x5f1   : > { %v1205_v28 = vmul.f32 0.7978846, %v1203_v27  ;;  %v1204_v29 = vmul.f32 0.7978846, %v1202_v26 }
 0x5f3   : > { %2022 = vtanh.f32 %v1205_v28 }
 0x5f4   : > { %2024 = vtanh.f32 %v1204_v29 }
 0x5f9   : > { %v2023_v30 = vpop.eup %2022 }
 0x5fa   : > { %v2025_v31 = vpop.eup %2024  ;;  %v1209_v32 = vadd.f32 1.0, %v2023_v30 }
 0x5fb   : > { %v1208_v33 = vadd.f32 1.0, %v2025_v31 }
 0x5fc   : > { %v1211_v34 = vmul.f32 0.5, %v1209_v32 }
 0x5fd   : > { %v1210_v35 = vmul.f32 0.5, %v1208_v33 }
 0x5fe   : > { %v1213_v36 = vmul.f32 %v1211_v34, %v1194_v19  ;;  %v2011_v19 = vld [vmem:[%s2802_s15] ss:$0 sm:$0xff]  ;;  %v1375_v34 = vld [vmem:[%s2805_s18 + $0x10] sm:$0xff] }
 0x5ff   : > { %v1212_v37 = vmul.f32 %v1210_v35, %v1174_v18  ;;  %1399 = vmatpush.msra.mxu1 %v1375_v34  ;;  %v1374_v35 = vld [vmem:[%s2805_s18 + $0x8] sm:$0xff] }
 0x600   : > { %1286 = vmatmul.f32.vlgmr.msrb.gmra.mxu3 %v1213_v36  ;;  %v1373_v36 = vld [vmem:[%s2805_s18] sm:$0xff] }
 0x601   : > { %1266 = vmatmul.f32.vlgmr.msrb.gmra.mxu2 %v1212_v37  ;;  %1400 = vmatpush.msra.mxu1 %v1374_v35  ;;  %v1351_v37 = vld [vmem:[%s2804_s17] sm:$0x1] }
 0x603   : > { %1401 = vmatpush.msra.mxu1 %v1373_v36 }
 0x683   : > { %v1287_v41 = vpop.f32.mrf.mxu3 }
 0x684   : > { %v1267_v39 = vpop.f32.mrf.mxu2 }
 0x685   : > { %v1268_v40 = vadd.f32 %v2009_v38, %v1267_v39 }
 0x687   : > { %v1288_v42 = vadd.f32 %v1287_v41, %v1268_v40  ;;  %v1407_v41 = vld [vmem:[%s2807_s20 + $0x8] sm:$0x3] }
 0x688   : > { %1897 = vmatpush.msk.msra.mxu2 %vm1413_vm13, %v1407_v41 }
 0x689   : > { %v1290_v43 = vadd.f32 %v1288_v42, %v2540_v49  ;;  %v1348_v49 = vld [vmem:[%s2803_s16 + $0x68] sm:$0xff]  ;;  %v1406_v42 = vld [vmem:[%s2807_s20] sm:$0xff] }
 0x68a   : > { %1354 = vmatpush.msra.mxu0 %v1348_v49  ;;  %1432 = vmatpush.msra.mxu2 %v1406_v42 }
 0x68b   : > { %1291 = vadd.xlane.f32.xlu0 %v1290_v43 }
 0x68c   : > { %1355 = vmatpush.msra.mxu0 %v1347_v51 }
 0x68e   : > { %1356 = vmatpush.msra.mxu0 %v1346_v52 }
 0x690   : > { %1357 = vmatpush.msra.mxu0 %v1345_v53 }
 0x692   : > { %1358 = vmatpush.msra.mxu0 %v1344_v54 }
 0x694   : > { %1359 = vmatpush.msra.mxu0 %v1343_v55 }
 0x696   : > { %1360 = vmatpush.msra.mxu0 %v1342_v56 }
 0x698   : > { %1361 = vmatpush.msra.mxu0 %v1341_v57 }
 0x69a   : > { %1362 = vmatpush.msra.mxu0 %v1340_v58 }
 0x69c   : > { %1363 = vmatpush.msra.mxu0 %v1339_v59 }
 0x69e   : > { %1364 = vmatpush.msra.mxu0 %v1338_v62  ;;  %v2207_v62 = vmov 2475754826  }
 0x6a0   : > { %1365 = vmatpush.msra.mxu0 %v1337_v0 }
 0x6a2   : > { %1366 = vmatpush.msra.mxu0 %v1336_v1  ;;  %v2208_v1 = vmov 2131351028  }
 0x6fe   : > { %v1292_v44 = vpop.xlane.xlu0 %1291 }
 0x6ff   : > { %v1293_v45 = vmul.f32 %v1292_v44, %v2445_v13 }
 0x701   : > { %v2552_v46 = vsub.f32 %v1290_v43, %v1293_v45  ;;  %v1381_v43 = vld [vmem:[%s2806_s19] sm:$0x1] }
 0x702   : > { %v1438_v45 = vld [vmem:[%s2809_s22] sm:$0x1] }
 0x703   : > { %v1295_v47 = vmul.f32 %v2552_v46, %v2552_v46 }
 0x705   : > { %1296 = vadd.xlane.f32.xlu1 %v1295_v47  ;;  %v2205_v47 = vmov 0  }
 0x706   : > { %2000 = vset.pattern.permute.xlu1 %v2205_v47  ;;  %2001 = vset.pattern.permute.xlu0 %v2205_v47 }
 0x707   : > { %2002 = vset.pattern.permute.xlu2 %v2205_v47 }
 0x778   : > { %v1297_v60 = vpop.xlane.xlu1 %1296 }
 0x779   : > { %v1298_v61 = vmul.f32 %v1297_v60, %v2445_v13  ;;  %v1335_v13 = vld [vmem:[%s2803_s16] sm:$0xff]  ;;  %v2206_v60 = vmov 683565275  }
 0x77a   : > { %1367 = vmatpush.msra.mxu0 %v1335_v13 }
 0x77b   : > { %v1299_v63 = vadd.f32 1e-12, %v1298_v61 }
 0x77d   : > { %2026 = vrsqrt.f32 %v1299_v63  ;;  %vm1306_vm9 = vweird.f32 %v1299_v63 }
 0x77e   : > { %2028 = vrcp.f32 %v2204_v6  ;;  %v2210_v6 = vmov 920167782  }
 0x783   : > { %v2027_v2 = vpop.eup %2026 }
 0x784   : > { %v1301_v5 = vmul.f32 %v2027_v2, %v1299_v63  ;;  %vm1307_vm8 = vweird.f32 %v2027_v2  ;;  %v2029_v14 = vpop.eup %2028 }
 0x785   : > { %vm1308_vm10 = vmor %vm1306_vm9, %vm1307_vm8  ;;  %v1328_v18 = vmul.f32 8.0, %v2029_v14  ;;  %vm1332_vm11 = vweird.f32 %v2029_v14 }
 0x786   : > { %v1302_v8 = vmul.f32 %v2027_v2, %v1301_v5 }
 0x787   : > { %v1329_v22 = vsub.f32 1.0, %v1328_v18 }
 0x788   : > { %v1303_v10 = vmul.f32 0.5, %v1302_v8 }
 0x789   : > { %v1330_v25 = vmul.f32 %v2029_v14, %v1329_v22 }
 0x78a   : > { %v1304_v12 = vsub.f32 1.5, %v1303_v10 }
 0x78b   : > { %v1331_v28 = vadd.f32 %v2029_v14, %v1330_v25 }
 0x78c   : > { %v1305_v15 = vmul.f32 %v2027_v2, %v1304_v12 }
 0x78d   : > { %v1333_v31 = vsel %vm1332_vm11, %v2029_v14, %v1331_v28 }
 0x78e   : > { %v1309_v17 = vsel %vm1308_vm10, %v2027_v2, %v1305_v15 }
 0x78f   : > { %v1310_v20 = vmul.f32 %v1309_v17, %v2552_v46 }
 0x791   : > { %v1315_v21 = vmul.f32 %v2010_v16, %v1310_v20 }
 0x793   : > { %v1320_v23 = vadd.f32 %v2011_v19, %v1315_v21 }
 0x795   : > { %v1321_v24 = vrot.slane %v1320_v23, 4 }
 0x797   : > { %v1322_v26 = vadd.f32 %v1321_v24, %v1320_v23 }
 0x799   : > { %v1323_v27 = vrot.slane %v1322_v26, 2 }
 0x79b   : > { %v1324_v29 = vadd.f32 %v1323_v27, %v1322_v26 }
 0x79d   : > { %v1325_v30 = vrot.slane %v1324_v29, 1 }
 0x79f   : > { %v1326_v32 = vadd.f32 %v1325_v30, %v1324_v29 }
 0x7a1   : > { %v1334_v33 = vmul.f32 %v1333_v31, %v1326_v32 }
 0x7a3   : > { %1368 = vmatmul.f32.vlgmr.msra.gmra.mxu0 %v1334_v33 }
 0x820   : > { %v1369_v38 = vpop.f32.mrf.mxu0 }
 0x821   : > { %v1370_v39 = vadd.f32 %v1369_v38, %v1351_v37 }
 0x823   : > { %v1372_v40 = vmax.f32 %v1370_v39, 0.0 }
 0x825   : > { %1896 = vmatmul.msk.f32.vlgmr.msra.gmra.mxu1 %vm1382_vm12, %v1372_v40 }
 0x8a2   : > { %v1403_v44 = vpop.f32.mrf.mxu1 }
 0x8a3   : > { %v2652_v46 = vadd.f32 %v1403_v44, %v1381_v43 }
 0x8a5   : > { %v2657_v48 = vmul.f32 %v1438_v45, %v2652_v46  ;;  %1898 = vmatmul.msk.f32.vlgmr.msra.gmra.mxu2 %vm1409_vm14, %v2652_v46 }
 0x8a7   : > { %v1443_v50 = vand.u32 2139095040, %v2657_v48  ;;  %v1440_v52 = vand.u32 2147483647, %v2657_v48  ;;  %vm1442_vm11 = vcmp.lt.s32.totalorder %v2657_v48, 0 }
 0x8a9   : > { %v1444_v49 = vshrl.u32 %v1443_v50, 23  ;;  %v1447_v54 = vand.u32 8388607, %v1440_v52  ;;  %vm2718_vm12 = vcmp.le.f32.partialorder %v1440_v52, 0.7853982 }
 0x8ab   : > { %v1899_v51 = vadd.s32 4294967169, %v1444_v49  ;;  %v1448_v58 = vor.u32 8388608, %v1447_v54 }
 0x8ad   : > { %v1450_v53 = vadd.s32 1, %v1899_v51  ;;  %v2677_v17 = vshll.u32 %v1448_v58, 8 }
 0x8af   : > { %vm1451_vm15 = vcmp.gt.s32.totalorder %v1450_v53, 0  ;;  %v1489_v26 = vand.u32 65535, %v2677_v17  ;;  %v1490_v27 = vshrl.u32 %v2677_v17, 16 }
 0x8b0   : > { %v1452_v55 = vsel %vm1451_vm15, %v1450_v53, 0 }
 0x8b1   : > { %v1454_v56 = vand.u32 31, %v1452_v55  ;;  %v2668_v59 = vshrl.u32 %v1452_v55, 5 }
 0x8b3   : > { %v2666_v57 = vsub.s32 32, %v1454_v56  ;;  %v1457_v61 = vshll.u32 %v2206_v60, %v1454_v56  ;;  %v1460_v63 = vshll.u32 %v2207_v62, %v1454_v56  ;;  %v1463_v2 = vshll.u32 %v2208_v1, %v1454_v56 }
 0x8b4   : > { %v1466_v5 = vshll.u32 %v2209_v3, %v1454_v56  ;;  %v1469_v8 = vshll.u32 %v2210_v6, %v1454_v56  ;;  %vm1472_vm0 = vcmp.lt.s32.totalorder %v2668_v59, 1  ;;  %vm1475_vm1 = vcmp.lt.s32.totalorder %v2668_v59, 4 }
 0x8b5   : > { %v1458_v0 = vshrl.u32 %v2207_v62, %v2666_v57  ;;  %v1461_v13 = vshrl.u32 %v2208_v1, %v2666_v57  ;;  %v1464_v4 = vshrl.u32 %v2209_v3, %v2666_v57  ;;  %v1467_v7 = vshrl.u32 %v2210_v6, %v2666_v57 }
 0x8b6   : > { %v1470_v10 = vshrl.u32 %v2211_v9, %v2666_v57  ;;  %vm1474_vm2 = vcmp.lt.s32.totalorder %v2668_v59, 3  ;;  %vm1473_vm3 = vcmp.lt.s32.totalorder %v2668_v59, 2  ;;  %v1456_v56 = vshrl.u32 %v2206_v60, %v2666_v57 }
 0x8b7   : > { %v1459_v11 = vor.u32 %v1458_v0, %v1457_v61  ;;  %v1462_v12 = vor.u32 %v1461_v13, %v1460_v63  ;;  %v1465_v14 = vor.u32 %v1464_v4, %v1463_v2  ;;  %v1468_v15 = vor.u32 %v1467_v7, %v1466_v5 }
 0x8b8   : > { %v1471_v16 = vor.u32 %v1470_v10, %v1469_v8 }
 0x8b9   : > { %v1480_v18 = vsel %vm1472_vm0, %v1459_v11, %v1462_v12  ;;  %v1484_v19 = vsel %vm1472_vm0, %v1462_v12, %v1465_v14  ;;  %v1481_v20 = vsel %vm1475_vm1, %v1468_v15, 920167782  ;;  %v1477_v53 = vsel %vm1475_vm1, %v1465_v14, 2102212464 }
 0x8ba   : > { %v1485_v21 = vsel %vm1475_vm1, %v1471_v16, 1326507024  ;;  %v1482_v22 = vsel %vm1474_vm2, %v1465_v14, %v1481_v20  ;;  %v1476_v1 = vsel %vm1472_vm0, %v1456_v56, %v1459_v11  ;;  %v1478_v13 = vsel %vm1474_vm2, %v1462_v12, %v1477_v53 }
 0x8bb   : > { %v1486_v23 = vsel %vm1474_vm2, %v1468_v15, %v1485_v21  ;;  %v1483_v24 = vsel %vm1473_vm3, %v1480_v18, %v1482_v22  ;;  %v1479_v57 = vsel %vm1473_vm3, %v1476_v1, %v1478_v13  ;;  %vm1583_vm2 = vweird.f32 %v2657_v48 }
 0x8bc   : > { %v1487_v25 = vsel %vm1473_vm3, %v1484_v19, %v1486_v23  ;;  %v1513_v30 = vand.u32 65535, %v1483_v24  ;;  %v1514_v31 = vshrl.u32 %v1483_v24, 16  ;;  %v1533_v8 = vmul.u32 %v2677_v17, %v1479_v57 }
 0x8bd   : > { %v1491_v28 = vand.u32 65535, %v1487_v25  ;;  %v1492_v29 = vshrl.u32 %v1487_v25, 16 }
 0x8be   : > { %v1516_v34 = vmul.u32 %v1514_v31, %v1489_v26  ;;  %v1517_v35 = vmul.u32 %v1513_v30, %v1490_v27  ;;  %v1515_v39 = vmul.u32 %v1513_v30, %v1489_v26  ;;  %v1518_v43 = vmul.u32 %v1514_v31, %v1490_v27 }
 0x8bf   : > { %v1494_v32 = vmul.u32 %v1492_v29, %v1489_v26  ;;  %v1495_v33 = vmul.u32 %v1491_v28, %v1490_v27  ;;  %v1493_v36 = vmul.u32 %v1491_v28, %v1489_v26  ;;  %v1496_v38 = vmul.u32 %v1492_v29, %v1490_v27 }
 0x8c0   : > { %v1519_v40 = vshll.u32 %v1516_v34, 16  ;;  %v1521_v45 = vshll.u32 %v1517_v35, 16  ;;  %v1520_v63 = vshrl.u32 %v1516_v34, 16  ;;  %v1522_v4 = vshrl.u32 %v1517_v35, 16 }
 0x8c1   : > { %v1497_v37 = vshll.u32 %v1494_v32, 16  ;;  %v1499_v41 = vshll.u32 %v1495_v33, 16  ;;  %v1498_v58 = vshrl.u32 %v1494_v32, 16  ;;  %v1500_v2 = vshrl.u32 %v1495_v33, 16 }
 0x8c2   : > { %vm1523_vm5 = vc.u32 %v1515_v39, %v1519_v40  ;;  %v1525_v50 = vadd.s32 %v1519_v40, %v1515_v39 }
 0x8c3   : > { %vm1501_vm4 = vc.u32 %v1493_v36, %v1497_v37  ;;  %v1503_v42 = vadd.s32 %v1497_v37, %v1493_v36  ;;  %v1524_v51 = vsel %vm1523_vm5, 1, %v2205_v47 }
 0x8c4   : > { %v1502_v44 = vsel %vm1501_vm4, 1, %v2205_v47  ;;  %v1526_v55 = vadd.s32 %v1524_v51, %v1518_v43  ;;  %vm1527_vm7 = vc.u32 %v1525_v50, %v1521_v45  ;;  %v1529_v7 = vadd.s32 %v1525_v50, %v1521_v45 }
 0x8c5   : > { %v1504_v49 = vadd.s32 %v1502_v44, %v1496_v38  ;;  %vm1505_vm6 = vc.u32 %v1503_v42, %v1499_v41  ;;  %v1528_v62 = vsel %vm1527_vm7, 1, %v2205_v47 }
 0x8c6   : > { %v1506_v54 = vsel %vm1505_vm6, 1, %v2205_v47  ;;  %v1530_v0 = vadd.s32 %v1528_v62, %v1526_v55 }
 0x8c7   : > { %v1508_v61 = vadd.s32 %v1506_v54, %v1504_v49 }
 0x8c8   : > { %v1531_v5 = vadd.s32 %v1530_v0, %v1520_v63 }
 0x8c9   : > { %v1509_v3 = vadd.s32 %v1508_v61, %v1498_v58 }
 0x8ca   : > { %v1532_v60 = vadd.s32 %v1531_v5, %v1522_v4 }
 0x8cb   : > { %v1510_v6 = vadd.s32 %v1509_v3, %v1500_v2 }
 0x8cc   : > { %v1536_v47 = vadd.s32 1, %v1532_v60 }
 0x8cd   : > { %vm1535_vm8 = vc.u32 %v1510_v6, %v1529_v7  ;;  %v1534_v59 = vadd.s32 %v1529_v7, %v1510_v6 }
 0x8ce   : > { %v1537_v9 = vsel %vm1535_vm8, %v1536_v47, %v1532_v60 }
 0x8cf   : > { %v1538_v10 = vadd.s32 %v1537_v9, %v1533_v8 }
 0x8d1   : > { %v1539_v11 = vadd.s32 536870912, %v1538_v10 }
 0x8d3   : > { %v1540_v14 = vshrl.u32 %v1539_v11, 30 }
 0x8d5   : > { %v1541_v15 = vshll.u32 %v1540_v14, 30  ;;  %v1564_v39 = vsub.s32 4, %v1540_v14 }
 0x8d7   : > { %v1542_v12 = vsub.s32 %v1538_v10, %v1541_v15  ;;  %v1565_v44 = vsel %vm1442_vm11, %v1564_v39, %v1540_v14 }
 0x8d8   : > { %v1567_v52 = vsel %vm2718_vm12, 0, %v1565_v44 }
 0x8d9   : > { %vm1543_vm9 = vcmp.lt.s32.totalorder %v1542_v12, 0  ;;  %v1544_v16 = vsub.s32 0, %v1542_v12  ;;  %v1584_v55 = vand.u32 3, %v1567_v52 }
 0x8db   : > { %v1545_v18 = vsel %vm1543_vm9, %v1544_v16, %v1542_v12  ;;  %vm1586_vm15 = vcmp.eq.s32.totalorder %v1584_v55, 0  ;;  %vm1589_vm0 = vcmp.eq.s32.totalorder %v1584_v55, 2  ;;  %vm1585_vm1 = vcmp.lt.s32.totalorder %v1584_v55, 2 }
 0x8dc   : > { %v1546_v19 = vclz %v1545_v18 }
 0x8de   : > { %v1900_v20 = vadd.s32 4294967294, %v1546_v19 }
 0x8e0   : > { %vm1901_vm10 = vcmp.lt.s32.totalorder %v1900_v20, 0 }
 0x8e1   : > { %v1549_v21 = vsel %vm1901_vm10, 0, %v1900_v20  ;;  %v1594_v20 = vlaneseq }
 0x8e2   : > { %v1550_v22 = vsub.s32 32, %v1549_v21  ;;  %v1554_v23 = vsub.s32 4294967266, %v1549_v21  ;;  %v1551_v24 = vshll.u32 %v1542_v12, %v1549_v21 }
 0x8e4   : > { %v1552_v25 = vshrl.u32 %v1534_v59, %v1550_v22  ;;  %v1555_v26 = vadd.s32 127, %v1554_v23  ;;  %v1595_v59 = vand.u32 127, %v1594_v20 }
 0x8e6   : > { %v1553_v17 = vor.u32 %v1552_v25, %v1551_v24  ;;  %v1556_v27 = vshll.u32 %v1555_v26, 23  ;;  %vm1601_vm3 = vcmp.eq.s32.totalorder %v1595_v59, 1  ;;  %vm1612_vm4 = vcmp.eq.s32.totalorder %v1595_v59, 2 }
 0x8e7   : > { %vm1623_vm5 = vcmp.eq.s32.totalorder %v1595_v59, 3  ;;  %vm1634_vm6 = vcmp.eq.s32.totalorder %v1595_v59, 4  ;;  %vm1645_vm7 = vcmp.eq.s32.totalorder %v1595_v59, 5  ;;  %vm1656_vm8 = vcmp.eq.s32.totalorder %v1595_v59, 6 }
 0x8e8   : > { %v1557_v28 = vor.u32 4788187, %v1556_v27  ;;  %v1560_v30 = vcvt.s32.f32 %v1553_v17  ;;  %vm1667_vm9 = vcmp.eq.s32.totalorder %v1595_v59, 7  ;;  %vm1678_vm10 = vcmp.eq.s32.totalorder %v1595_v59, 8 }
 0x8ea   : > { %v1558_v29 = vand.u32 2147483647, %v1557_v28 }
 0x8ec   : > { %v1561_v31 = vmul.f32 %v1560_v30, %v1558_v29 }
 0x8ee   : > { %v1562_v32 = vxor.u32 2147483648, %v1561_v31 }
 0x8f0   : > { %v1563_v34 = vsel %vm1442_vm11, %v1562_v32, %v1561_v31  ;;  %vm1689_vm11 = vcmp.eq.s32.totalorder %v1595_v59, 9 }
 0x8f1   : > { %v1566_v35 = vsel %vm2718_vm12, %v2657_v48, %v1563_v34  ;;  %v1408_v48 = vld [vmem:[%s2864_s3] sm:$0x1] }
 0x8f2   : > { %v1568_v36 = vmul.f32 %v1566_v35, %v1566_v35 }
 0x8f4   : > { %v1569_v37 = vmul.f32 -0.001358992, %v1568_v36  ;;  %v1576_v38 = vmul.f32 -0.00019511016, %v1568_v36 }
 0x8f6   : > { %v1570_v40 = vadd.f32 0.041655596, %v1569_v37  ;;  %v1577_v41 = vadd.f32 0.008332121, %v1576_v38 }
 0x8f8   : > { %v1571_v42 = vmul.f32 %v1570_v40, %v1568_v36  ;;  %v1578_v43 = vmul.f32 %v1577_v41, %v1568_v36 }
 0x8fa   : > { %v1572_v45 = vadd.f32 -0.4999988, %v1571_v42  ;;  %v1579_v50 = vadd.f32 -0.16666654, %v1578_v43 }
 0x8fc   : > { %v1573_v49 = vmul.f32 %v1572_v45, %v1568_v36  ;;  %v1580_v51 = vmul.f32 %v1579_v50, %v1568_v36 }
 0x8fe   : > { %v1574_v53 = vadd.f32 1.0, %v1573_v49  ;;  %v1581_v54 = vadd.f32 1.0, %v1580_v51 }
 0x900   : > { %v1582_v56 = vmul.f32 %v1581_v54, %v1566_v35  ;;  %v1590_v58 = vxor.u32 2147483648, %v1574_v53 }
 0x902   : > { %v1587_v61 = vxor.u32 2147483648, %v1582_v56  ;;  %v1591_v63 = vsel %vm1589_vm0, %v1590_v58, %v1582_v56 }
 0x904   : > { %v1588_v62 = vsel %vm1586_vm15, %v1574_v53, %v1587_v61 }
 0x905   : > { %v1592_v0 = vsel %vm1585_vm1, %v1588_v62, %v1591_v63 }
 0x906   : > { %v1593_v1 = vsel %vm1583_vm2, nan, %v1592_v0 }
 0x907   : > { %1619 = vrot.lane.b32.xlu1 %v1593_v1, %s2212_s1  ;;  %1608 = vrot.lane.b32.xlu0 %v1593_v1, %s2213_s6  ;;  %s2865_s1 = sld [smem:[#allocation31_spill]] }
 0x908   : > { %1597 = vrot.lane.b32.xlu2 %v1593_v1, %s2214_s26 }
 0x90d   : > { %v1717_v26 = vld [vmem:[%s2865_s1 + $0x8] sm:$0x3]  ;;  %v1716_v17 = vld [vmem:[%s2865_s1] sm:$0xff] }
 0x90e   : > { %1902 = vmatpush.msk.msrb.mxu2 %vm1413_vm13, %v1717_v26  ;;  %vm1712_vm13 = vcmask 73728  }
 0x90f   : > { %1663 = vrot.lane.b32.xlu1 %v1593_v1, %s2215_s28  ;;  %1641 = vrot.lane.b32.xlu0 %v1593_v1, %s2216_s21 }
 0x910   : > { %1630 = vrot.lane.b32.xlu2 %v1593_v1, %s2217_s23  ;;  %1739 = vmatpush.msrb.mxu2 %v1716_v17 }
 0x917   : > { %1674 = vrot.lane.b32.xlu0 %v1593_v1, %s2218_s24  ;;  %s2867_s24 = sld [smem:[#allocation32_spill]] }
 0x918   : > { %1652 = vrot.lane.b32.xlu2 %v1593_v1, %s2219_s29 }
 0x91d   : > { %s1763_s29 = scalar_lea.hbm %s2867_s24, %s2372_s7  ;;  %s2142_s26 = scalar_lea.hbm %s2867_s24, 2 }
 0x91e   : > { %s1767_s4 = sshll.u32 %s1763_s29, 4  ;;  %s1768_s4 = int_to_ptr.hbm [resolvable:$true] %s1767_s4 }
 0x91f   : > { %s2136_s3 = sshra.s32 %s1768_s4, 4  ;;  %s2137_s3 = int_to_ptr.hbm [resolvable:$true] %s2136_s3 }
 0x920   : > { %1685 = vrot.lane.b32.xlu2 %v1593_v1, %s2220_s30  ;;  %s1765_s30 = sshll.u32 %s2734_s8, 4  ;;  %s2138_s5 = scalar_lea.hbm %s2137_s3, 1  ;;  %s1766_s30 = int_to_ptr.vmem [resolvable:$true] %s1765_s30 }
 0x921   : > { %p2139_p0 = scmp.ne.s32.totalorder %s2137_s3, %s2138_s5  ;;  %p2143_p3 = scmp.lt.s32.totalorder %s2137_s3, %s2867_s24 }
 0x922   : > { %p2144_p4 = scmp.lt.s32.totalorder %s2142_s26, %s2138_s5 }
 0x923   : > { %p2140_p1 = pnand %p2139_p0, %p2389_p5 }
 0x924   : > { %p2145_p7 = por %p2144_p4, %p2143_p3 }
 0x925   : > { %p2141_p2 = pneg %p2140_p1 }
 0x927   : > { %p2146_p8 = pnand %p2145_p7, %p2141_p2 }
 0x928   : > { %v1434_v13 = vpop.f32.mrf.mxu2 }
 0x929   : > { %v1435_v2 = vadd.f32 %v1434_v13, %v1408_v48 }
 0x92b   : > { %1437 = vst [vmem:[%s2734_s8] sm:$0x1] %v1435_v2 }
 0x962   : > { %v1598_v3 = vpop.permute.xlu2 %1597 }
 0x963   : > { %v1600_v4 = vmul.f32 %v1598_v3, %v1593_v1 }
 0x965   : > { %1604 = vperm.xlu1 %2000, %v1600_v4  }
 0x96a   : > { %v1631_v5 = vpop.permute.xlu2 %1630 }
 0x972   : > { %v1653_v10 = vpop.permute.xlu2 %1652 }
 0x979   : > { %v1609_v6 = vpop.permute.xlu0 %1608  ;;  %v1620_v57 = vpop.permute.xlu1 %1619 }
 0x97a   : > { %v1611_v7 = vmul.f32 %v1609_v6, %v1600_v4  ;;  %v1686_v18 = vpop.permute.xlu2 %1685 }
 0x97c   : > { %v1622_v60 = vmul.f32 %v1620_v57, %v1611_v7  ;;  %1615 = vperm.xlu0 %2001, %v1611_v7  }
 0x97e   : > { %1626 = vperm.xlu2 %2002, %v1622_v60   ;;  %v1633_v47 = vmul.f32 %v1631_v5, %v1622_v60 }
 0x980   : > { %1637 = vperm.xlu1 %2000, %v1633_v47  }
 0x981   : > { %v1642_v8 = vpop.permute.xlu0 %1641  ;;  %v1664_v14 = vpop.permute.xlu1 %1663 }
 0x982   : > { %v1644_v9 = vmul.f32 %v1642_v8, %v1633_v47 }
 0x984   : > { %v1655_v11 = vmul.f32 %v1653_v10, %v1644_v9 }
 0x986   : > { %1648 = vperm.xlu2 %2002, %v1644_v9   ;;  %v1666_v15 = vmul.f32 %v1664_v14, %v1655_v11 }
 0x988   : > { %1659 = vperm.xlu1 %2000, %v1655_v11   ;;  %1670 = vperm.xlu0 %2001, %v1666_v15  }
 0x989   : > { %v1675_v12 = vpop.permute.xlu0 %1674 }
 0x98a   : > { %v1677_v16 = vmul.f32 %v1675_v12, %v1666_v15 }
 0x98c   : > { %v1688_v19 = vmul.f32 %v1686_v18, %v1677_v16 }
 0x98e   : > { %1681 = vperm.xlu2 %2002, %v1677_v16  }
 0x990   : > { %1692 = vperm.xlu1 %2000, %v1688_v19  }
 0x9d7   : > { %v1605_v21 = vpop.permute.xlu1 %1604 }
 0x9d8   : > { %v1627_v22 = vpop.permute.xlu2 %1626  ;;  %v1607_v25 = vsel %vm1601_vm3, %v1605_v21, %v1593_v1 }
 0x9e0   : > { %v1649_v28 = vpop.permute.xlu2 %1648 }
 0x9e8   : > { %v1682_v36 = vpop.permute.xlu2 %1681 }
 0x9ee   : > { %v1616_v23 = vpop.permute.xlu0 %1615 }
 0x9ef   : > { %v1618_v27 = vsel %vm1612_vm4, %v1616_v23, %v1607_v25 }
 0x9f0   : > { %v1629_v29 = vsel %vm1623_vm5, %v1627_v22, %v1618_v27 }
 0x9f2   : > { %v1638_v24 = vpop.permute.xlu1 %1637 }
 0x9f3   : > { %v1640_v30 = vsel %vm1634_vm6, %v1638_v24, %v1629_v29 }
 0x9f4   : > { %v1651_v32 = vsel %vm1645_vm7, %v1649_v28, %v1640_v30 }
 0x9fa   : > { %v1660_v31 = vpop.permute.xlu1 %1659  ;;  %v1671_v34 = vpop.permute.xlu0 %1670 }
 0x9fb   : > { %v1662_v33 = vsel %vm1656_vm8, %v1660_v31, %v1651_v32 }
 0x9fc   : > { %v1673_v35 = vsel %vm1667_vm9, %v1671_v34, %v1662_v33 }
 0x9fd   : > { %v1684_v38 = vsel %vm1678_vm10, %v1682_v36, %v1673_v35 }
 0xa02   : > { %v1693_v37 = vpop.permute.xlu1 %1692 }
 0xa03   : > { %v1695_v39 = vsel %vm1689_vm11, %v1693_v37, %v1684_v38 }
 0xa04   : > { %2030 = vrcp.f32 %v1695_v39  ;;  %v1696_v40 = vmul.f32 %v1695_v39, %v2652_v46  ;;  %v1708_v45 = vand.u32 2147483648, %v1695_v39  ;;  %v1706_v52 = vand.u32 2147483647, %v1695_v39 }
 0xa05   : > { %vm1702_vm15 = vweird.f32 %v1695_v39 }
 0xa06   : > { %v1713_v41 = vsel %vm1712_vm13, %v1696_v40, 0.0  ;;  %v1709_v51 = vor.u32 1.1754944e-38, %v1708_v45  ;;  %vm1707_vm1 = vcmp.eq.f32.partialorder %v1706_v52, 8.507059e+37 }
 0xa07   : > { %1714 = vadd.xlane.f32.xlu0 %v1713_v41 }
 0xa0a   : > { %v2031_v42 = vpop.eup %2030 }
 0xa0b   : > { %v1698_v43 = vmul.f32 %v2031_v42, %v1695_v39  ;;  %vm1703_vm12 = vweird.f32 %v2031_v42 }
 0xa0c   : > { %vm1704_vm0 = vmor %vm1702_vm15, %vm1703_vm12 }
 0xa0d   : > { %v1699_v44 = vsub.f32 1.0, %v1698_v43 }
 0xa0f   : > { %v1700_v50 = vmul.f32 %v2031_v42, %v1699_v44 }
 0xa11   : > { %v1701_v49 = vadd.f32 %v2031_v42, %v1700_v50 }
 0xa13   : > { %v1705_v53 = vsel %vm1704_vm0, %v2031_v42, %v1701_v49 }
 0xa14   : > { %v1710_v54 = vsel %vm1707_vm1, %v1709_v51, %v1705_v53 }
 0xa15   : > { %v1711_v55 = vmul.f32 %v1710_v54, %v2652_v46 }
 0xa17   : > { %1903 = vmatmul.msk.f32.vlgmr.msrb.gmra.mxu2 %vm1409_vm14, %v1711_v55 }
 0xa18   : > { %2149 = shalt.err (!%p2146_p8)
}
 0xa19   : > { %1918 = dma.vmem_to_hbm [thread:$0]  (%p2389_p5), %s1766_s30, 16, %s1768_s4, %s1752_s9   ;;  %vm1749_vm14 = vcmask 0  }
 0xa1a   : > { %s2868_s8 = sld [smem:[#allocation33_spill]] }
 0xa20   : > { %s831_s23 = scalar_lea.vmem %s2868_s8, %s2439_s10 }
 0xa7a   : > { %v1715_v61 = vpop.xlane.xlu0 %1714 }
 0xa9a   : > { %v1741_v46 = vpop.f32.mrf.mxu2 }
 0xa9b   : > { %v1744_v56 = vmul.f32 %v1741_v46, %v1696_v40 }
 0xa9d   : > { %v1745_v58 = vsel %vm1712_vm13, %v1744_v56, 0.0 }
 0xa9e   : > { %1746 = vadd.xlane.f32.xlu2 %v1745_v58 }
 0xb11   : > { %v1747_v62 = vpop.xlane.xlu2 %1746 }
 0xb12   : > { %v1748_v63 = vadd.f32 %v1747_v62, %v1715_v61 }
 0xb14   : > { %1750 = vst.msk [vmem:[%s831_s23] sm:$0x1] %vm1749_vm14, %v1748_v63 }
 0xb15 PF: > { %s2869_s1 = sld [smem:[#allocation14_spill]] }
 0xb16   : > { %s2870_s29 = sld [smem:[#allocation12_spill]] }
 0xb1b   : > { %p1940_p9 = scmp.ge.s32.totalorder %s2869_s1, 2 }
 0xb1c   : > { %s1782_s30 = sand.u32 1, %s2870_s29  }
 0xb1d   : > { %p1931_p5 = pnand %p1940_p9, %p2393_p6  ;;  %s1783_s4 = scalar_lea.sflag [#allocation4], %s1782_s30 }
 0xb1f   : > { %p1932_p10 = pneg %p1931_p5 }
 0xb21   : > { %2175 = dma.done.wait (%p1932_p10), %s1783_s4, 16  }
 0xb22   : > { %2177 = vsyncadd (%p1932_p10), %s1783_s4, 4294967280  ;;  %s2872_s30 = sld [smem:[#allocation15_spill]]  ;;  %s2875_s29 = smov %s2184_s2 }
 0xb23   : > { %s2873_s10 = sld [smem:[#allocation13_spill]] }
 0xb24   : > { %s2874_s6 = sld [smem:[#allocation16_spill]] }
 0xb28   : > { %p38_p11 = scmp.ge.s32.totalorder %s2872_s30, 4  }
 0xb29   : > { %s2876_s2 = smov %s2873_s10 }
 0xb2a   :  { %40 = sbr.rel (!%p38_p11) target bundleno = 21 (0x15), region = 179 }
 0xb2f   :  { %1794 = vsyncpa [#allocation3], 1 }
 0xb30   :  { %1796 = vsyncpa [#allocation3 + $0x1], 1 }
 0xb31   :  { %1797 = vsyncpa [#allocation6], 1 }
 0xb32   :  { %1798 = vsyncpa [#allocation4], 1 }
 0xb33   :  { %1800 = vsyncpa [#allocation4 + $0x1], 1 }

</bundles_post_ra>
